<compile_context>
chip_gen: v6e
topology: v6e:2x2x1
jax: 0.10.0
libtpu: 0.0.40
codegen_flags: <defaults>
</compile_context>

<pallas_src>
import math

import jax
import jax.numpy as jnp
from jax.experimental import pallas as pl
from jax.experimental.pallas import tpu as pltpu

NUM_CLASSES = 24
NUM_CLASSES_PADDED = 128  # pad class dim to 128 lanes for dense stores


# ---------------------------------------------------------------------------
# Kernel A: full feature extractor for ONE image per grid step.
#   conv1(3x3, 3->32) + bias + ReLU + BN  -> maxpool(3, 3, pad=1)
#   conv2(3x3, 32->64) + bias + ReLU + BN -> maxpool(2, 2, pad=1)
# All intermediates (including -inf pool padding) stay in VMEM scratch; the
# only HBM traffic is the input image and the (1, 16, 64) pooled output.
# ---------------------------------------------------------------------------
def feature_kernel(x_ref, w1_ref, b1_ref, g1_ref, h1_ref,
                   w2_ref, b2_ref, g2_ref, h2_ref,
                   out_ref,
                   p1_buf, pool1_buf, p2_buf):
    # ---- stage 1: conv1 + ReLU + BN written into -inf padded 28x28 buffer --
    p1_buf[...] = jnp.full(p1_buf.shape, -jnp.inf, dtype=jnp.float32)

    @pl.loop(0, 26)
    def _conv1_row(h):
        acc = jnp.zeros((26, 32), dtype=jnp.float32)
        for kh in range(3):
            for kw in range(3):
                xs = x_ref[0, h + kh, pl.ds(kw, 26), :]            # (26, 3) bf16
                acc = acc + jnp.dot(xs, w1_ref[kh, kw],
                                    preferred_element_type=jnp.float32)
        y = jnp.maximum(acc + b1_ref[...], 0.0)                    # bias + ReLU
        y = y * g1_ref[...] + h1_ref[...]                          # folded BN
        p1_buf[h + 1, pl.ds(1, 26), :] = y                         # interior

    # ---- maxpool 3x3 stride 3 on padded 28x28 -> (9, 9, 32) ----------------
    m1 = jnp.full((9, 9, 32), -jnp.inf, dtype=jnp.float32)
    for dh in range(3):
        for dw in range(3):
            m1 = jnp.maximum(
                m1, p1_buf[pl.ds(dh, 9, stride=3), pl.ds(dw, 9, stride=3), :])
    pool1_buf[...] = m1.astype(jnp.bfloat16)

    # ---- stage 2: conv2 + ReLU + BN written into -inf padded 9x9 buffer ----
    p2_buf[...] = jnp.full(p2_buf.shape, -jnp.inf, dtype=jnp.float32)

    @pl.loop(0, 7)
    def _conv2_row(h):
        acc = jnp.zeros((7, 64), dtype=jnp.float32)
        for kh in range(3):
            for kw in range(3):
                xs = pool1_buf[h + kh, pl.ds(kw, 7), :]            # (7, 32) bf16
                acc = acc + jnp.dot(xs, w2_ref[kh, kw],
                                    preferred_element_type=jnp.float32)
        y = jnp.maximum(acc + b2_ref[...], 0.0)
        y = y * g2_ref[...] + h2_ref[...]
        p2_buf[h + 1, pl.ds(1, 7), :] = y

    # ---- maxpool 2x2 stride 2 on padded 9x9 -> (4, 4, 64) ------------------
    m2 = jnp.full((4, 4, 64), -jnp.inf, dtype=jnp.float32)
    for dh in range(2):
        for dw in range(2):
            m2 = jnp.maximum(
                m2, p2_buf[pl.ds(dh, 4, stride=2), pl.ds(dw, 4, stride=2), :])

    # Flatten spatially in HWC order (fc1 weights are stored in this layout).
    for h in range(4):
        out_ref[0, pl.ds(h * 4, 4), :] = m2[h].astype(out_ref.dtype)


def feature_extractor(x_nhwc, w1, b1, g1, h1, w2, b2, g2, h2):
    N = x_nhwc.shape[0]
    return pl.pallas_call(
        feature_kernel,
        out_shape=jax.ShapeDtypeStruct((N, 16, 64), jnp.bfloat16),
        grid=(N,),
        in_specs=[
            pl.BlockSpec((1, 28, 28, 3), lambda n: (n, 0, 0, 0)),
            pl.BlockSpec((3, 3, 3, 32), lambda n: (0, 0, 0, 0)),
            pl.BlockSpec((1, 32), lambda n: (0, 0)),
            pl.BlockSpec((1, 32), lambda n: (0, 0)),
            pl.BlockSpec((1, 32), lambda n: (0, 0)),
            pl.BlockSpec((3, 3, 32, 64), lambda n: (0, 0, 0, 0)),
            pl.BlockSpec((1, 64), lambda n: (0, 0)),
            pl.BlockSpec((1, 64), lambda n: (0, 0)),
            pl.BlockSpec((1, 64), lambda n: (0, 0)),
        ],
        out_specs=pl.BlockSpec((1, 16, 64), lambda n: (n, 0, 0)),
        scratch_shapes=[
            pltpu.VMEM((28, 28, 32), jnp.float32),   # padded conv1 out (pool1 in)
            pltpu.VMEM((9, 9, 32), jnp.bfloat16),    # pool1 out (conv2 in)
            pltpu.VMEM((9, 9, 64), jnp.float32),     # padded conv2 out (pool2 in)
        ],
        compiler_params=pltpu.CompilerParams(
            dimension_semantics=("parallel",)),
    )(x_nhwc, w1, b1, g1, h1, w2, b2, g2, h2)


# ---------------------------------------------------------------------------
# Kernel B: fused FC head over the whole batch:
#   Linear(1024->512) + ReLU + Linear(512->128 zero-padded from 24)
# Weights in bf16, fp32 accumulation; 128-wide output => lane-dense stores.
# ---------------------------------------------------------------------------
def mlp_head_kernel(x_ref, w1_ref, b1_ref, w2_ref, b2_ref, o_ref):
    h = jnp.dot(x_ref[...], w1_ref[...], preferred_element_type=jnp.float32)
    h = jnp.maximum(h + b1_ref[...], 0.0).astype(jnp.bfloat16)
    o = jnp.dot(h, w2_ref[...], preferred_element_type=jnp.float32) + b2_ref[...]
    o_ref[...] = o


def mlp_head(x, w1, b1, w2, b2):
    N, D = x.shape
    Hd = w1.shape[1]
    O = w2.shape[1]
    bn = min(N, 128)  # batch block; "parallel" grid shards batches across TCs
    return pl.pallas_call(
        mlp_head_kernel,
        out_shape=jax.ShapeDtypeStruct((N, O), jnp.float32),
        grid=(pl.cdiv(N, bn),),
        in_specs=[
            pl.BlockSpec((bn, D), lambda i: (i, 0)),
            pl.BlockSpec((D, Hd), lambda i: (0, 0)),
            pl.BlockSpec((1, Hd), lambda i: (0, 0)),
            pl.BlockSpec((Hd, O), lambda i: (0, 0)),
            pl.BlockSpec((1, O), lambda i: (0, 0)),
        ],
        out_specs=pl.BlockSpec((bn, O), lambda i: (i, 0)),
        compiler_params=pltpu.CompilerParams(
            dimension_semantics=("parallel",)),
    )(x, w1, b1, w2, b2)


# ---------------------------------------------------------------------------
# Parameter initialization (deterministic, shapes from the nn.Module)
# ---------------------------------------------------------------------------
def _bn_fold(key, c, eps=1e-5):
    k1, k2, k3, k4 = jax.random.split(key, 4)
    gamma = 1.0 + 0.1 * jax.random.normal(k1, (c,), jnp.float32)
    beta = 0.1 * jax.random.normal(k2, (c,), jnp.float32)
    running_mean = 0.1 * jax.random.normal(k3, (c,), jnp.float32)
    running_var = 1.0 + 0.1 * jax.random.uniform(k4, (c,), jnp.float32)
    scale = gamma * jax.lax.rsqrt(running_var + eps)
    shift = beta - running_mean * scale
    return scale.reshape(1, c), shift.reshape(1, c)


def init_params(key):
    ks = jax.random.split(key, 8)
    p = {}
    # Conv2d(3, 32, 3): stored (KH, KW, Cin, Cout); bf16 weights, f32 bias.
    p["w1"] = (jax.random.normal(ks[0], (3, 3, 3, 32), jnp.float32)
               / math.sqrt(3 * 3 * 3)).astype(jnp.bfloat16)
    p["b1"] = (0.1 * jax.random.normal(ks[1], (32,), jnp.float32)).reshape(1, 32)
    p["g1"], p["h1"] = _bn_fold(ks[2], 32)
    # Conv2d(32, 64, 3)
    p["w2"] = (jax.random.normal(ks[3], (3, 3, 32, 64), jnp.float32)
               / math.sqrt(3 * 3 * 32)).astype(jnp.bfloat16)
    p["b2"] = (0.1 * jax.random.normal(ks[4], (64,), jnp.float32)).reshape(1, 64)
    p["g2"], p["h2"] = _bn_fold(ks[5], 64)
    # Linear(1024, 512): stored (in, out); the input axis is in HWC-flatten
    # order (h*256 + w*64 + c).  To port PyTorch weights (C,H,W flatten order),
    # permute rows: fw1_hwc[h*256 + w*64 + c, :] = W_torch.T[c*16 + h*4 + w, :].
    p["fw1"] = (jax.random.normal(ks[6], (16 * 64, 512), jnp.float32)
                / math.sqrt(16 * 64)).astype(jnp.bfloat16)
    p["fb1"] = jnp.zeros((1, 512), jnp.float32)
    # Linear(512, 24): class dim zero-padded to 128 for lane-dense stores.
    fw2 = jax.random.normal(ks[7], (512, NUM_CLASSES), jnp.float32) / math.sqrt(512)
    p["fw2"] = jnp.pad(
        fw2, ((0, 0), (0, NUM_CLASSES_PADDED - NUM_CLASSES))).astype(jnp.bfloat16)
    p["fb2"] = jnp.zeros((1, NUM_CLASSES_PADDED), jnp.float32)
    return p


# ---------------------------------------------------------------------------
# Forward pass: 2 pallas_calls total (fused conv stack, fused MLP head).
# ---------------------------------------------------------------------------
def cnn_forward(x_nchw, p):
    N = x_nchw.shape[0]
    x = jnp.transpose(x_nchw, (0, 2, 3, 1)).astype(jnp.bfloat16)     # NCHW -> NHWC
    feat = feature_extractor(x, p["w1"], p["b1"], p["g1"], p["h1"],
                             p["w2"], p["b2"], p["g2"], p["h2"])      # (N, 16, 64)
    flat = feat.reshape(N, 16 * 64)                                   # (N, 1024)
    logits = mlp_head(flat, p["fw1"], p["fb1"], p["fw2"], p["fb2"])   # (N, 128)
    return logits[:, :NUM_CLASSES]                                    # (N, 24)


if __name__ == "__main__":
    key = jax.random.PRNGKey(0)
    kx, kp = jax.random.split(key)
    # Input spatial size is dictated by the module: Linear(4*4*64) => 28x28 input.
    x = jax.random.normal(kx, (2, 3, 28, 28), jnp.float32)            # NCHW
    params = init_params(kp)

    out = jax.block_until_ready(cnn_forward(x, params))
    assert out.shape == (2, NUM_CLASSES), out.shape
    assert bool(jnp.all(jnp.isfinite(out)))
    print("KERNEL_OK")
</pallas_src>

<mosaic_0001>
module attributes {stable_mosaic.version = 11 : i64} {
  func.func @feature_kernel(%arg0: i32, %arg1: memref<1x28x28x3xbf16, #tpu.memory_space<vmem>>, %arg2: memref<3x3x3x32xbf16, #tpu.memory_space<vmem>>, %arg3: memref<1x32xf32, #tpu.memory_space<vmem>>, %arg4: memref<1x32xf32, #tpu.memory_space<vmem>>, %arg5: memref<1x32xf32, #tpu.memory_space<vmem>>, %arg6: memref<3x3x32x64xbf16, #tpu.memory_space<vmem>>, %arg7: memref<1x64xf32, #tpu.memory_space<vmem>>, %arg8: memref<1x64xf32, #tpu.memory_space<vmem>>, %arg9: memref<1x64xf32, #tpu.memory_space<vmem>>, %arg10: memref<1x16x64xbf16, #tpu.memory_space<vmem>>, %arg11: memref<28x28x32xf32, #tpu.memory_space<vmem>>, %arg12: memref<9x9x32xbf16, #tpu.memory_space<vmem>>, %arg13: memref<9x9x64xf32, #tpu.memory_space<vmem>>) attributes {dimension_semantics = [#tpu.dimension_semantics<parallel>], iteration_bounds = array<i64: 2>, scalar_prefetch = 0 : i64, scratch_operands = 3 : i64, tpu.core_type = #tpu.core_type<tc>, window_params = [{transform_indices = @transform_0, window_bounds = array<i64: 1, 28, 28, 3>}, {pipeline_mode = #tpu.pipeline_mode<synchronous>, transform_indices = @transform_1, window_bounds = array<i64: 3, 3, 3, 32>}, {pipeline_mode = #tpu.pipeline_mode<synchronous>, transform_indices = @transform_2, window_bounds = array<i64: 1, 32>}, {pipeline_mode = #tpu.pipeline_mode<synchronous>, transform_indices = @transform_3, window_bounds = array<i64: 1, 32>}, {pipeline_mode = #tpu.pipeline_mode<synchronous>, transform_indices = @transform_4, window_bounds = array<i64: 1, 32>}, {pipeline_mode = #tpu.pipeline_mode<synchronous>, transform_indices = @transform_5, window_bounds = array<i64: 3, 3, 32, 64>}, {pipeline_mode = #tpu.pipeline_mode<synchronous>, transform_indices = @transform_6, window_bounds = array<i64: 1, 64>}, {pipeline_mode = #tpu.pipeline_mode<synchronous>, transform_indices = @transform_7, window_bounds = array<i64: 1, 64>}, {pipeline_mode = #tpu.pipeline_mode<synchronous>, transform_indices = @transform_8, window_bounds = array<i64: 1, 64>}, {transform_indices = @transform_9, window_bounds = array<i64: 1, 16, 64>}]} {
    %cst = arith.constant 0xFF800000 : f32
    %0 = vector.broadcast %cst : f32 to vector<28x28x32xf32>
    %c0 = arith.constant 0 : index
    %c0_0 = arith.constant 0 : index
    %c0_1 = arith.constant 0 : index
    %1 = vector.load %arg11[%c0, %c0_0, %c0_1] : memref<28x28x32xf32, #tpu.memory_space<vmem>>, vector<28x28x32xf32>
    tpu.vector_store %arg11[%c0, %c0_0, %c0_1], %0 {strides = array<i32>} : memref<28x28x32xf32, #tpu.memory_space<vmem>>, vector<28x28x32xf32>,
    %c0_i32 = arith.constant 0 : i32
    %c26_i32 = arith.constant 26 : i32
    %2 = arith.addi %c0_i32, %c26_i32 : i32
    %c1_i32 = arith.constant 1 : i32
    scf.for %arg14 = %c0_i32 to %2 step %c1_i32  : i32 {
      %c1_i32_61 = arith.constant 1 : i32
      %60 = arith.muli %arg14, %c1_i32_61 : i32
      %c0_i32_62 = arith.constant 0 : i32
      %61 = arith.addi %c0_i32_62, %60 : i32
      %cst_63 = arith.constant 0.000000e+00 : f32
      %62 = vector.broadcast %cst_63 : f32 to vector<26x32xf32>
      %c0_i32_64 = arith.constant 0 : i32
      %63 = arith.addi %61, %c0_i32_64 : i32
      %c0_65 = arith.constant 0 : index
      %64 = arith.index_cast %63 : i32 to index
      %c0_66 = arith.constant 0 : index
      %c0_67 = arith.constant 0 : index
      %65 = vector.load %arg1[%c0_65, %64, %c0_66, %c0_67] : memref<1x28x28x3xbf16, #tpu.memory_space<vmem>>, vector<1x1x26x3xbf16>
      %66 = vector.shape_cast %65 : vector<1x1x26x3xbf16> to vector<26x3xbf16>
      %c0_68 = arith.constant 0 : index
      %c0_69 = arith.constant 0 : index
      %c0_70 = arith.constant 0 : index
      %c0_71 = arith.constant 0 : index
      %67 = vector.load %arg2[%c0_68, %c0_69, %c0_70, %c0_71] : memref<3x3x3x32xbf16, #tpu.memory_space<vmem>>, vector<1x1x3x32xbf16>
      %68 = vector.shape_cast %67 : vector<1x1x3x32xbf16> to vector<3x32xbf16>
      %cst_72 = arith.constant dense<0.000000e+00> : vector<26x32xf32>
      %69 = tpu.matmul %66, %68, %cst_72 {dimension_numbers = #tpu.dot_dimension_numbers<[1], [0], [0], [1], [0, 0, 1, 1], [], []>} : vector<26x3xbf16>, vector<3x32xbf16>, vector<26x32xf32> -> vector<26x32xf32>
      %70 = arith.addf %62, %69 : vector<26x32xf32>
      %c0_i32_73 = arith.constant 0 : i32
      %71 = arith.addi %61, %c0_i32_73 : i32
      %c0_74 = arith.constant 0 : index
      %72 = arith.index_cast %71 : i32 to index
      %c1_75 = arith.constant 1 : index
      %c0_76 = arith.constant 0 : index
      %73 = vector.load %arg1[%c0_74, %72, %c1_75, %c0_76] : memref<1x28x28x3xbf16, #tpu.memory_space<vmem>>, vector<1x1x26x3xbf16>
      %74 = vector.shape_cast %73 : vector<1x1x26x3xbf16> to vector<26x3xbf16>
      %c0_77 = arith.constant 0 : index
      %c1_78 = arith.constant 1 : index
      %c0_79 = arith.constant 0 : index
      %c0_80 = arith.constant 0 : index
      %75 = vector.load %arg2[%c0_77, %c1_78, %c0_79, %c0_80] : memref<3x3x3x32xbf16, #tpu.memory_space<vmem>>, vector<1x1x3x32xbf16>
      %76 = vector.shape_cast %75 : vector<1x1x3x32xbf16> to vector<3x32xbf16>
      %cst_81 = arith.constant dense<0.000000e+00> : vector<26x32xf32>
      %77 = tpu.matmul %74, %76, %cst_81 {dimension_numbers = #tpu.dot_dimension_numbers<[1], [0], [0], [1], [0, 0, 1, 1], [], []>} : vector<26x3xbf16>, vector<3x32xbf16>, vector<26x32xf32> -> vector<26x32xf32>
      %78 = arith.addf %70, %77 : vector<26x32xf32>
      %c0_i32_82 = arith.constant 0 : i32
      %79 = arith.addi %61, %c0_i32_82 : i32
      %c0_83 = arith.constant 0 : index
      %80 = arith.index_cast %79 : i32 to index
      %c2_84 = arith.constant 2 : index
      %c0_85 = arith.constant 0 : index
      %81 = vector.load %arg1[%c0_83, %80, %c2_84, %c0_85] : memref<1x28x28x3xbf16, #tpu.memory_space<vmem>>, vector<1x1x26x3xbf16>
      %82 = vector.shape_cast %81 : vector<1x1x26x3xbf16> to vector<26x3xbf16>
      %c0_86 = arith.constant 0 : index
      %c2_87 = arith.constant 2 : index
      %c0_88 = arith.constant 0 : index
      %c0_89 = arith.constant 0 : index
      %83 = vector.load %arg2[%c0_86, %c2_87, %c0_88, %c0_89] : memref<3x3x3x32xbf16, #tpu.memory_space<vmem>>, vector<1x1x3x32xbf16>
      %84 = vector.shape_cast %83 : vector<1x1x3x32xbf16> to vector<3x32xbf16>
      %cst_90 = arith.constant dense<0.000000e+00> : vector<26x32xf32>
      %85 = tpu.matmul %82, %84, %cst_90 {dimension_numbers = #tpu.dot_dimension_numbers<[1], [0], [0], [1], [0, 0, 1, 1], [], []>} : vector<26x3xbf16>, vector<3x32xbf16>, vector<26x32xf32> -> vector<26x32xf32>
      %86 = arith.addf %78, %85 : vector<26x32xf32>
      %c1_i32_91 = arith.constant 1 : i32
      %87 = arith.addi %61, %c1_i32_91 : i32
      %c0_92 = arith.constant 0 : index
      %88 = arith.index_cast %87 : i32 to index
      %c0_93 = arith.constant 0 : index
      %c0_94 = arith.constant 0 : index
      %89 = vector.load %arg1[%c0_92, %88, %c0_93, %c0_94] : memref<1x28x28x3xbf16, #tpu.memory_space<vmem>>, vector<1x1x26x3xbf16>
      %90 = vector.shape_cast %89 : vector<1x1x26x3xbf16> to vector<26x3xbf16>
      %c1_95 = arith.constant 1 : index
      %c0_96 = arith.constant 0 : index
      %c0_97 = arith.constant 0 : index
      %c0_98 = arith.constant 0 : index
      %91 = vector.load %arg2[%c1_95, %c0_96, %c0_97, %c0_98] : memref<3x3x3x32xbf16, #tpu.memory_space<vmem>>, vector<1x1x3x32xbf16>
      %92 = vector.shape_cast %91 : vector<1x1x3x32xbf16> to vector<3x32xbf16>
      %cst_99 = arith.constant dense<0.000000e+00> : vector<26x32xf32>
      %93 = tpu.matmul %90, %92, %cst_99 {dimension_numbers = #tpu.dot_dimension_numbers<[1], [0], [0], [1], [0, 0, 1, 1], [], []>} : vector<26x3xbf16>, vector<3x32xbf16>, vector<26x32xf32> -> vector<26x32xf32>
      %94 = arith.addf %86, %93 : vector<26x32xf32>
      %c1_i32_100 = arith.constant 1 : i32
      %95 = arith.addi %61, %c1_i32_100 : i32
      %c0_101 = arith.constant 0 : index
      %96 = arith.index_cast %95 : i32 to index
      %c1_102 = arith.constant 1 : index
      %c0_103 = arith.constant 0 : index
      %97 = vector.load %arg1[%c0_101, %96, %c1_102, %c0_103] : memref<1x28x28x3xbf16, #tpu.memory_space<vmem>>, vector<1x1x26x3xbf16>
      %98 = vector.shape_cast %97 : vector<1x1x26x3xbf16> to vector<26x3xbf16>
      %c1_104 = arith.constant 1 : index
      %c1_105 = arith.constant 1 : index
      %c0_106 = arith.constant 0 : index
      %c0_107 = arith.constant 0 : index
      %99 = vector.load %arg2[%c1_104, %c1_105, %c0_106, %c0_107] : memref<3x3x3x32xbf16, #tpu.memory_space<vmem>>, vector<1x1x3x32xbf16>
      %100 = vector.shape_cast %99 : vector<1x1x3x32xbf16> to vector<3x32xbf16>
      %cst_108 = arith.constant dense<0.000000e+00> : vector<26x32xf32>
      %101 = tpu.matmul %98, %100, %cst_108 {dimension_numbers = #tpu.dot_dimension_numbers<[1], [0], [0], [1], [0, 0, 1, 1], [], []>} : vector<26x3xbf16>, vector<3x32xbf16>, vector<26x32xf32> -> vector<26x32xf32>
      %102 = arith.addf %94, %101 : vector<26x32xf32>
      %c1_i32_109 = arith.constant 1 : i32
      %103 = arith.addi %61, %c1_i32_109 : i32
      %c0_110 = arith.constant 0 : index
      %104 = arith.index_cast %103 : i32 to index
      %c2_111 = arith.constant 2 : index
      %c0_112 = arith.constant 0 : index
      %105 = vector.load %arg1[%c0_110, %104, %c2_111, %c0_112] : memref<1x28x28x3xbf16, #tpu.memory_space<vmem>>, vector<1x1x26x3xbf16>
      %106 = vector.shape_cast %105 : vector<1x1x26x3xbf16> to vector<26x3xbf16>
      %c1_113 = arith.constant 1 : index
      %c2_114 = arith.constant 2 : index
      %c0_115 = arith.constant 0 : index
      %c0_116 = arith.constant 0 : index
      %107 = vector.load %arg2[%c1_113, %c2_114, %c0_115, %c0_116] : memref<3x3x3x32xbf16, #tpu.memory_space<vmem>>, vector<1x1x3x32xbf16>
      %108 = vector.shape_cast %107 : vector<1x1x3x32xbf16> to vector<3x32xbf16>
      %cst_117 = arith.constant dense<0.000000e+00> : vector<26x32xf32>
      %109 = tpu.matmul %106, %108, %cst_117 {dimension_numbers = #tpu.dot_dimension_numbers<[1], [0], [0], [1], [0, 0, 1, 1], [], []>} : vector<26x3xbf16>, vector<3x32xbf16>, vector<26x32xf32> -> vector<26x32xf32>
      %110 = arith.addf %102, %109 : vector<26x32xf32>
      %c2_i32 = arith.constant 2 : i32
      %111 = arith.addi %61, %c2_i32 : i32
      %c0_118 = arith.constant 0 : index
      %112 = arith.index_cast %111 : i32 to index
      %c0_119 = arith.constant 0 : index
      %c0_120 = arith.constant 0 : index
      %113 = vector.load %arg1[%c0_118, %112, %c0_119, %c0_120] : memref<1x28x28x3xbf16, #tpu.memory_space<vmem>>, vector<1x1x26x3xbf16>
      %114 = vector.shape_cast %113 : vector<1x1x26x3xbf16> to vector<26x3xbf16>
      %c2_121 = arith.constant 2 : index
      %c0_122 = arith.constant 0 : index
      %c0_123 = arith.constant 0 : index
      %c0_124 = arith.constant 0 : index
      %115 = vector.load %arg2[%c2_121, %c0_122, %c0_123, %c0_124] : memref<3x3x3x32xbf16, #tpu.memory_space<vmem>>, vector<1x1x3x32xbf16>
      %116 = vector.shape_cast %115 : vector<1x1x3x32xbf16> to vector<3x32xbf16>
      %cst_125 = arith.constant dense<0.000000e+00> : vector<26x32xf32>
      %117 = tpu.matmul %114, %116, %cst_125 {dimension_numbers = #tpu.dot_dimension_numbers<[1], [0], [0], [1], [0, 0, 1, 1], [], []>} : vector<26x3xbf16>, vector<3x32xbf16>, vector<26x32xf32> -> vector<26x32xf32>
      %118 = arith.addf %110, %117 : vector<26x32xf32>
      %c2_i32_126 = arith.constant 2 : i32
      %119 = arith.addi %61, %c2_i32_126 : i32
      %c0_127 = arith.constant 0 : index
      %120 = arith.index_cast %119 : i32 to index
      %c1_128 = arith.constant 1 : index
      %c0_129 = arith.constant 0 : index
      %121 = vector.load %arg1[%c0_127, %120, %c1_128, %c0_129] : memref<1x28x28x3xbf16, #tpu.memory_space<vmem>>, vector<1x1x26x3xbf16>
      %122 = vector.shape_cast %121 : vector<1x1x26x3xbf16> to vector<26x3xbf16>
      %c2_130 = arith.constant 2 : index
      %c1_131 = arith.constant 1 : index
      %c0_132 = arith.constant 0 : index
      %c0_133 = arith.constant 0 : index
      %123 = vector.load %arg2[%c2_130, %c1_131, %c0_132, %c0_133] : memref<3x3x3x32xbf16, #tpu.memory_space<vmem>>, vector<1x1x3x32xbf16>
      %124 = vector.shape_cast %123 : vector<1x1x3x32xbf16> to vector<3x32xbf16>
      %cst_134 = arith.constant dense<0.000000e+00> : vector<26x32xf32>
      %125 = tpu.matmul %122, %124, %cst_134 {dimension_numbers = #tpu.dot_dimension_numbers<[1], [0], [0], [1], [0, 0, 1, 1], [], []>} : vector<26x3xbf16>, vector<3x32xbf16>, vector<26x32xf32> -> vector<26x32xf32>
      %126 = arith.addf %118, %125 : vector<26x32xf32>
      %c2_i32_135 = arith.constant 2 : i32
      %127 = arith.addi %61, %c2_i32_135 : i32
      %c0_136 = arith.constant 0 : index
      %128 = arith.index_cast %127 : i32 to index
      %c2_137 = arith.constant 2 : index
      %c0_138 = arith.constant 0 : index
      %129 = vector.load %arg1[%c0_136, %128, %c2_137, %c0_138] : memref<1x28x28x3xbf16, #tpu.memory_space<vmem>>, vector<1x1x26x3xbf16>
      %130 = vector.shape_cast %129 : vector<1x1x26x3xbf16> to vector<26x3xbf16>
      %c2_139 = arith.constant 2 : index
      %c2_140 = arith.constant 2 : index
      %c0_141 = arith.constant 0 : index
      %c0_142 = arith.constant 0 : index
      %131 = vector.load %arg2[%c2_139, %c2_140, %c0_141, %c0_142] : memref<3x3x3x32xbf16, #tpu.memory_space<vmem>>, vector<1x1x3x32xbf16>
      %132 = vector.shape_cast %131 : vector<1x1x3x32xbf16> to vector<3x32xbf16>
      %cst_143 = arith.constant dense<0.000000e+00> : vector<26x32xf32>
      %133 = tpu.matmul %130, %132, %cst_143 {dimension_numbers = #tpu.dot_dimension_numbers<[1], [0], [0], [1], [0, 0, 1, 1], [], []>} : vector<26x3xbf16>, vector<3x32xbf16>, vector<26x32xf32> -> vector<26x32xf32>
      %134 = arith.addf %126, %133 : vector<26x32xf32>
      %c0_144 = arith.constant 0 : index
      %c0_145 = arith.constant 0 : index
      %135 = vector.load %arg3[%c0_144, %c0_145] : memref<1x32xf32, #tpu.memory_space<vmem>>, vector<1x32xf32>
      %136 = vector.broadcast %135 : vector<1x32xf32> to vector<26x32xf32>
      %137 = arith.addf %134, %136 : vector<26x32xf32>
      %cst_146 = arith.constant 0.000000e+00 : f32
      %138 = vector.broadcast %cst_146 : f32 to vector<26x32xf32>
      %139 = arith.maximumf %137, %138 : vector<26x32xf32>
      %c0_147 = arith.constant 0 : index
      %c0_148 = arith.constant 0 : index
      %140 = vector.load %arg4[%c0_147, %c0_148] : memref<1x32xf32, #tpu.memory_space<vmem>>, vector<1x32xf32>
      %141 = vector.broadcast %140 : vector<1x32xf32> to vector<26x32xf32>
      %142 = arith.mulf %139, %141 : vector<26x32xf32>
      %c0_149 = arith.constant 0 : index
      %c0_150 = arith.constant 0 : index
      %143 = vector.load %arg5[%c0_149, %c0_150] : memref<1x32xf32, #tpu.memory_space<vmem>>, vector<1x32xf32>
      %144 = vector.broadcast %143 : vector<1x32xf32> to vector<26x32xf32>
      %145 = arith.addf %142, %144 : vector<26x32xf32>
      %c1_i32_151 = arith.constant 1 : i32
      %146 = arith.addi %61, %c1_i32_151 : i32
      %147 = arith.index_cast %146 : i32 to index
      %c1_152 = arith.constant 1 : index
      %c0_153 = arith.constant 0 : index
      %148 = vector.load %arg11[%147, %c1_152, %c0_153] : memref<28x28x32xf32, #tpu.memory_space<vmem>>, vector<1x26x32xf32>
      %149 = vector.shape_cast %148 : vector<1x26x32xf32> to vector<26x32xf32>
      %150 = vector.shape_cast %145 : vector<26x32xf32> to vector<1x26x32xf32>
      tpu.vector_store %arg11[%147, %c1_152, %c0_153], %150 {strides = array<i32>} : memref<28x28x32xf32, #tpu.memory_space<vmem>>, vector<1x26x32xf32>,
    }
    %c26_i32_2 = arith.constant 26 : i32
    %cst_3 = arith.constant 0xFF800000 : f32
    %3 = vector.broadcast %cst_3 : f32 to vector<9x9x32xf32>
    %c0_4 = arith.constant 0 : index
    %c0_5 = arith.constant 0 : index
    %c0_6 = arith.constant 0 : index
    %4 = tpu.strided_load %arg11[%c0_4, %c0_5, %c0_6] {strides = array<i32: 3, 3, 1>} : memref<28x28x32xf32, #tpu.memory_space<vmem>>, vector<9x9x32xf32>
    %5 = arith.maximumf %3, %4 : vector<9x9x32xf32>
    %c0_7 = arith.constant 0 : index
    %c1 = arith.constant 1 : index
    %c0_8 = arith.constant 0 : index
    %6 = tpu.strided_load %arg11[%c0_7, %c1, %c0_8] {strides = array<i32: 3, 3, 1>} : memref<28x28x32xf32, #tpu.memory_space<vmem>>, vector<9x9x32xf32>
    %7 = arith.maximumf %5, %6 : vector<9x9x32xf32>
    %c0_9 = arith.constant 0 : index
    %c2 = arith.constant 2 : index
    %c0_10 = arith.constant 0 : index
    %8 = tpu.strided_load %arg11[%c0_9, %c2, %c0_10] {strides = array<i32: 3, 3, 1>} : memref<28x28x32xf32, #tpu.memory_space<vmem>>, vector<9x9x32xf32>
    %9 = arith.maximumf %7, %8 : vector<9x9x32xf32>
    %c1_11 = arith.constant 1 : index
    %c0_12 = arith.constant 0 : index
    %c0_13 = arith.constant 0 : index
    %10 = tpu.strided_load %arg11[%c1_11, %c0_12, %c0_13] {strides = array<i32: 3, 3, 1>} : memref<28x28x32xf32, #tpu.memory_space<vmem>>, vector<9x9x32xf32>
    %11 = arith.maximumf %9, %10 : vector<9x9x32xf32>
    %c1_14 = arith.constant 1 : index
    %c1_15 = arith.constant 1 : index
    %c0_16 = arith.constant 0 : index
    %12 = tpu.strided_load %arg11[%c1_14, %c1_15, %c0_16] {strides = array<i32: 3, 3, 1>} : memref<28x28x32xf32, #tpu.memory_space<vmem>>, vector<9x9x32xf32>
    %13 = arith.maximumf %11, %12 : vector<9x9x32xf32>
    %c1_17 = arith.constant 1 : index
    %c2_18 = arith.constant 2 : index
    %c0_19 = arith.constant 0 : index
    %14 = tpu.strided_load %arg11[%c1_17, %c2_18, %c0_19] {strides = array<i32: 3, 3, 1>} : memref<28x28x32xf32, #tpu.memory_space<vmem>>, vector<9x9x32xf32>
    %15 = arith.maximumf %13, %14 : vector<9x9x32xf32>
    %c2_20 = arith.constant 2 : index
    %c0_21 = arith.constant 0 : index
    %c0_22 = arith.constant 0 : index
    %16 = tpu.strided_load %arg11[%c2_20, %c0_21, %c0_22] {strides = array<i32: 3, 3, 1>} : memref<28x28x32xf32, #tpu.memory_space<vmem>>, vector<9x9x32xf32>
    %17 = arith.maximumf %15, %16 : vector<9x9x32xf32>
    %c2_23 = arith.constant 2 : index
    %c1_24 = arith.constant 1 : index
    %c0_25 = arith.constant 0 : index
    %18 = tpu.strided_load %arg11[%c2_23, %c1_24, %c0_25] {strides = array<i32: 3, 3, 1>} : memref<28x28x32xf32, #tpu.memory_space<vmem>>, vector<9x9x32xf32>
    %19 = arith.maximumf %17, %18 : vector<9x9x32xf32>
    %c2_26 = arith.constant 2 : index
    %c2_27 = arith.constant 2 : index
    %c0_28 = arith.constant 0 : index
    %20 = tpu.strided_load %arg11[%c2_26, %c2_27, %c0_28] {strides = array<i32: 3, 3, 1>} : memref<28x28x32xf32, #tpu.memory_space<vmem>>, vector<9x9x32xf32>
    %21 = arith.maximumf %19, %20 : vector<9x9x32xf32>
    %22 = arith.truncf %21 : vector<9x9x32xf32> to vector<9x9x32xbf16>
    %c0_29 = arith.constant 0 : index
    %c0_30 = arith.constant 0 : index
    %c0_31 = arith.constant 0 : index
    %23 = vector.load %arg12[%c0_29, %c0_30, %c0_31] : memref<9x9x32xbf16, #tpu.memory_space<vmem>>, vector<9x9x32xbf16>
    tpu.vector_store %arg12[%c0_29, %c0_30, %c0_31], %22 {strides = array<i32>} : memref<9x9x32xbf16, #tpu.memory_space<vmem>>, vector<9x9x32xbf16>,
    %cst_32 = arith.constant 0xFF800000 : f32
    %24 = vector.broadcast %cst_32 : f32 to vector<9x9x64xf32>
    %c0_33 = arith.constant 0 : index
    %c0_34 = arith.constant 0 : index
    %c0_35 = arith.constant 0 : index
    %25 = vector.load %arg13[%c0_33, %c0_34, %c0_35] : memref<9x9x64xf32, #tpu.memory_space<vmem>>, vector<9x9x64xf32>
    tpu.vector_store %arg13[%c0_33, %c0_34, %c0_35], %24 {strides = array<i32>} : memref<9x9x64xf32, #tpu.memory_space<vmem>>, vector<9x9x64xf32>,
    %c0_i32_36 = arith.constant 0 : i32
    %c7_i32 = arith.constant 7 : i32
    %26 = arith.addi %c0_i32_36, %c7_i32 : i32
    %c1_i32_37 = arith.constant 1 : i32
    scf.for %arg14 = %c0_i32_36 to %26 step %c1_i32_37  : i32 {
      %c1_i32_61 = arith.constant 1 : i32
      %60 = arith.muli %arg14, %c1_i32_61 : i32
      %c0_i32_62 = arith.constant 0 : i32
      %61 = arith.addi %c0_i32_62, %60 : i32
      %cst_63 = arith.constant 0.000000e+00 : f32
      %62 = vector.broadcast %cst_63 : f32 to vector<7x64xf32>
      %c0_i32_64 = arith.constant 0 : i32
      %63 = arith.addi %61, %c0_i32_64 : i32
      %64 = arith.index_cast %63 : i32 to index
      %c0_65 = arith.constant 0 : index
      %c0_66 = arith.constant 0 : index
      %65 = vector.load %arg12[%64, %c0_65, %c0_66] : memref<9x9x32xbf16, #tpu.memory_space<vmem>>, vector<1x7x32xbf16>
      %66 = vector.shape_cast %65 : vector<1x7x32xbf16> to vector<7x32xbf16>
      %c0_67 = arith.constant 0 : index
      %c0_68 = arith.constant 0 : index
      %c0_69 = arith.constant 0 : index
      %c0_70 = arith.constant 0 : index
      %67 = vector.load %arg6[%c0_67, %c0_68, %c0_69, %c0_70] : memref<3x3x32x64xbf16, #tpu.memory_space<vmem>>, vector<1x1x32x64xbf16>
      %68 = vector.shape_cast %67 : vector<1x1x32x64xbf16> to vector<32x64xbf16>
      %cst_71 = arith.constant dense<0.000000e+00> : vector<7x64xf32>
      %69 = tpu.matmul %66, %68, %cst_71 {dimension_numbers = #tpu.dot_dimension_numbers<[1], [0], [0], [1], [0, 0, 1, 1], [], []>} : vector<7x32xbf16>, vector<32x64xbf16>, vector<7x64xf32> -> vector<7x64xf32>
      %70 = arith.addf %62, %69 : vector<7x64xf32>
      %c0_i32_72 = arith.constant 0 : i32
      %71 = arith.addi %61, %c0_i32_72 : i32
      %72 = arith.index_cast %71 : i32 to index
      %c1_73 = arith.constant 1 : index
      %c0_74 = arith.constant 0 : index
      %73 = vector.load %arg12[%72, %c1_73, %c0_74] : memref<9x9x32xbf16, #tpu.memory_space<vmem>>, vector<1x7x32xbf16>
      %74 = vector.shape_cast %73 : vector<1x7x32xbf16> to vector<7x32xbf16>
      %c0_75 = arith.constant 0 : index
      %c1_76 = arith.constant 1 : index
      %c0_77 = arith.constant 0 : index
      %c0_78 = arith.constant 0 : index
      %75 = vector.load %arg6[%c0_75, %c1_76, %c0_77, %c0_78] : memref<3x3x32x64xbf16, #tpu.memory_space<vmem>>, vector<1x1x32x64xbf16>
      %76 = vector.shape_cast %75 : vector<1x1x32x64xbf16> to vector<32x64xbf16>
      %cst_79 = arith.constant dense<0.000000e+00> : vector<7x64xf32>
      %77 = tpu.matmul %74, %76, %cst_79 {dimension_numbers = #tpu.dot_dimension_numbers<[1], [0], [0], [1], [0, 0, 1, 1], [], []>} : vector<7x32xbf16>, vector<32x64xbf16>, vector<7x64xf32> -> vector<7x64xf32>
      %78 = arith.addf %70, %77 : vector<7x64xf32>
      %c0_i32_80 = arith.constant 0 : i32
      %79 = arith.addi %61, %c0_i32_80 : i32
      %80 = arith.index_cast %79 : i32 to index
      %c2_81 = arith.constant 2 : index
      %c0_82 = arith.constant 0 : index
      %81 = vector.load %arg12[%80, %c2_81, %c0_82] : memref<9x9x32xbf16, #tpu.memory_space<vmem>>, vector<1x7x32xbf16>
      %82 = vector.shape_cast %81 : vector<1x7x32xbf16> to vector<7x32xbf16>
      %c0_83 = arith.constant 0 : index
      %c2_84 = arith.constant 2 : index
      %c0_85 = arith.constant 0 : index
      %c0_86 = arith.constant 0 : index
      %83 = vector.load %arg6[%c0_83, %c2_84, %c0_85, %c0_86] : memref<3x3x32x64xbf16, #tpu.memory_space<vmem>>, vector<1x1x32x64xbf16>
      %84 = vector.shape_cast %83 : vector<1x1x32x64xbf16> to vector<32x64xbf16>
      %cst_87 = arith.constant dense<0.000000e+00> : vector<7x64xf32>
      %85 = tpu.matmul %82, %84, %cst_87 {dimension_numbers = #tpu.dot_dimension_numbers<[1], [0], [0], [1], [0, 0, 1, 1], [], []>} : vector<7x32xbf16>, vector<32x64xbf16>, vector<7x64xf32> -> vector<7x64xf32>
      %86 = arith.addf %78, %85 : vector<7x64xf32>
      %c1_i32_88 = arith.constant 1 : i32
      %87 = arith.addi %61, %c1_i32_88 : i32
      %88 = arith.index_cast %87 : i32 to index
      %c0_89 = arith.constant 0 : index
      %c0_90 = arith.constant 0 : index
      %89 = vector.load %arg12[%88, %c0_89, %c0_90] : memref<9x9x32xbf16, #tpu.memory_space<vmem>>, vector<1x7x32xbf16>
      %90 = vector.shape_cast %89 : vector<1x7x32xbf16> to vector<7x32xbf16>
      %c1_91 = arith.constant 1 : index
      %c0_92 = arith.constant 0 : index
      %c0_93 = arith.constant 0 : index
      %c0_94 = arith.constant 0 : index
      %91 = vector.load %arg6[%c1_91, %c0_92, %c0_93, %c0_94] : memref<3x3x32x64xbf16, #tpu.memory_space<vmem>>, vector<1x1x32x64xbf16>
      %92 = vector.shape_cast %91 : vector<1x1x32x64xbf16> to vector<32x64xbf16>
      %cst_95 = arith.constant dense<0.000000e+00> : vector<7x64xf32>
      %93 = tpu.matmul %90, %92, %cst_95 {dimension_numbers = #tpu.dot_dimension_numbers<[1], [0], [0], [1], [0, 0, 1, 1], [], []>} : vector<7x32xbf16>, vector<32x64xbf16>, vector<7x64xf32> -> vector<7x64xf32>
      %94 = arith.addf %86, %93 : vector<7x64xf32>
      %c1_i32_96 = arith.constant 1 : i32
      %95 = arith.addi %61, %c1_i32_96 : i32
      %96 = arith.index_cast %95 : i32 to index
      %c1_97 = arith.constant 1 : index
      %c0_98 = arith.constant 0 : index
      %97 = vector.load %arg12[%96, %c1_97, %c0_98] : memref<9x9x32xbf16, #tpu.memory_space<vmem>>, vector<1x7x32xbf16>
      %98 = vector.shape_cast %97 : vector<1x7x32xbf16> to vector<7x32xbf16>
      %c1_99 = arith.constant 1 : index
      %c1_100 = arith.constant 1 : index
      %c0_101 = arith.constant 0 : index
      %c0_102 = arith.constant 0 : index
      %99 = vector.load %arg6[%c1_99, %c1_100, %c0_101, %c0_102] : memref<3x3x32x64xbf16, #tpu.memory_space<vmem>>, vector<1x1x32x64xbf16>
      %100 = vector.shape_cast %99 : vector<1x1x32x64xbf16> to vector<32x64xbf16>
      %cst_103 = arith.constant dense<0.000000e+00> : vector<7x64xf32>
      %101 = tpu.matmul %98, %100, %cst_103 {dimension_numbers = #tpu.dot_dimension_numbers<[1], [0], [0], [1], [0, 0, 1, 1], [], []>} : vector<7x32xbf16>, vector<32x64xbf16>, vector<7x64xf32> -> vector<7x64xf32>
      %102 = arith.addf %94, %101 : vector<7x64xf32>
      %c1_i32_104 = arith.constant 1 : i32
      %103 = arith.addi %61, %c1_i32_104 : i32
      %104 = arith.index_cast %103 : i32 to index
      %c2_105 = arith.constant 2 : index
      %c0_106 = arith.constant 0 : index
      %105 = vector.load %arg12[%104, %c2_105, %c0_106] : memref<9x9x32xbf16, #tpu.memory_space<vmem>>, vector<1x7x32xbf16>
      %106 = vector.shape_cast %105 : vector<1x7x32xbf16> to vector<7x32xbf16>
      %c1_107 = arith.constant 1 : index
      %c2_108 = arith.constant 2 : index
      %c0_109 = arith.constant 0 : index
      %c0_110 = arith.constant 0 : index
      %107 = vector.load %arg6[%c1_107, %c2_108, %c0_109, %c0_110] : memref<3x3x32x64xbf16, #tpu.memory_space<vmem>>, vector<1x1x32x64xbf16>
      %108 = vector.shape_cast %107 : vector<1x1x32x64xbf16> to vector<32x64xbf16>
      %cst_111 = arith.constant dense<0.000000e+00> : vector<7x64xf32>
      %109 = tpu.matmul %106, %108, %cst_111 {dimension_numbers = #tpu.dot_dimension_numbers<[1], [0], [0], [1], [0, 0, 1, 1], [], []>} : vector<7x32xbf16>, vector<32x64xbf16>, vector<7x64xf32> -> vector<7x64xf32>
      %110 = arith.addf %102, %109 : vector<7x64xf32>
      %c2_i32 = arith.constant 2 : i32
      %111 = arith.addi %61, %c2_i32 : i32
      %112 = arith.index_cast %111 : i32 to index
      %c0_112 = arith.constant 0 : index
      %c0_113 = arith.constant 0 : index
      %113 = vector.load %arg12[%112, %c0_112, %c0_113] : memref<9x9x32xbf16, #tpu.memory_space<vmem>>, vector<1x7x32xbf16>
      %114 = vector.shape_cast %113 : vector<1x7x32xbf16> to vector<7x32xbf16>
      %c2_114 = arith.constant 2 : index
      %c0_115 = arith.constant 0 : index
      %c0_116 = arith.constant 0 : index
      %c0_117 = arith.constant 0 : index
      %115 = vector.load %arg6[%c2_114, %c0_115, %c0_116, %c0_117] : memref<3x3x32x64xbf16, #tpu.memory_space<vmem>>, vector<1x1x32x64xbf16>
      %116 = vector.shape_cast %115 : vector<1x1x32x64xbf16> to vector<32x64xbf16>
      %cst_118 = arith.constant dense<0.000000e+00> : vector<7x64xf32>
      %117 = tpu.matmul %114, %116, %cst_118 {dimension_numbers = #tpu.dot_dimension_numbers<[1], [0], [0], [1], [0, 0, 1, 1], [], []>} : vector<7x32xbf16>, vector<32x64xbf16>, vector<7x64xf32> -> vector<7x64xf32>
      %118 = arith.addf %110, %117 : vector<7x64xf32>
      %c2_i32_119 = arith.constant 2 : i32
      %119 = arith.addi %61, %c2_i32_119 : i32
      %120 = arith.index_cast %119 : i32 to index
      %c1_120 = arith.constant 1 : index
      %c0_121 = arith.constant 0 : index
      %121 = vector.load %arg12[%120, %c1_120, %c0_121] : memref<9x9x32xbf16, #tpu.memory_space<vmem>>, vector<1x7x32xbf16>
      %122 = vector.shape_cast %121 : vector<1x7x32xbf16> to vector<7x32xbf16>
      %c2_122 = arith.constant 2 : index
      %c1_123 = arith.constant 1 : index
      %c0_124 = arith.constant 0 : index
      %c0_125 = arith.constant 0 : index
      %123 = vector.load %arg6[%c2_122, %c1_123, %c0_124, %c0_125] : memref<3x3x32x64xbf16, #tpu.memory_space<vmem>>, vector<1x1x32x64xbf16>
      %124 = vector.shape_cast %123 : vector<1x1x32x64xbf16> to vector<32x64xbf16>
      %cst_126 = arith.constant dense<0.000000e+00> : vector<7x64xf32>
      %125 = tpu.matmul %122, %124, %cst_126 {dimension_numbers = #tpu.dot_dimension_numbers<[1], [0], [0], [1], [0, 0, 1, 1], [], []>} : vector<7x32xbf16>, vector<32x64xbf16>, vector<7x64xf32> -> vector<7x64xf32>
      %126 = arith.addf %118, %125 : vector<7x64xf32>
      %c2_i32_127 = arith.constant 2 : i32
      %127 = arith.addi %61, %c2_i32_127 : i32
      %128 = arith.index_cast %127 : i32 to index
      %c2_128 = arith.constant 2 : index
      %c0_129 = arith.constant 0 : index
      %129 = vector.load %arg12[%128, %c2_128, %c0_129] : memref<9x9x32xbf16, #tpu.memory_space<vmem>>, vector<1x7x32xbf16>
      %130 = vector.shape_cast %129 : vector<1x7x32xbf16> to vector<7x32xbf16>
      %c2_130 = arith.constant 2 : index
      %c2_131 = arith.constant 2 : index
      %c0_132 = arith.constant 0 : index
      %c0_133 = arith.constant 0 : index
      %131 = vector.load %arg6[%c2_130, %c2_131, %c0_132, %c0_133] : memref<3x3x32x64xbf16, #tpu.memory_space<vmem>>, vector<1x1x32x64xbf16>
      %132 = vector.shape_cast %131 : vector<1x1x32x64xbf16> to vector<32x64xbf16>
      %cst_134 = arith.constant dense<0.000000e+00> : vector<7x64xf32>
      %133 = tpu.matmul %130, %132, %cst_134 {dimension_numbers = #tpu.dot_dimension_numbers<[1], [0], [0], [1], [0, 0, 1, 1], [], []>} : vector<7x32xbf16>, vector<32x64xbf16>, vector<7x64xf32> -> vector<7x64xf32>
      %134 = arith.addf %126, %133 : vector<7x64xf32>
      %c0_135 = arith.constant 0 : index
      %c0_136 = arith.constant 0 : index
      %135 = vector.load %arg7[%c0_135, %c0_136] : memref<1x64xf32, #tpu.memory_space<vmem>>, vector<1x64xf32>
      %136 = vector.broadcast %135 : vector<1x64xf32> to vector<7x64xf32>
      %137 = arith.addf %134, %136 : vector<7x64xf32>
      %cst_137 = arith.constant 0.000000e+00 : f32
      %138 = vector.broadcast %cst_137 : f32 to vector<7x64xf32>
      %139 = arith.maximumf %137, %138 : vector<7x64xf32>
      %c0_138 = arith.constant 0 : index
      %c0_139 = arith.constant 0 : index
      %140 = vector.load %arg8[%c0_138, %c0_139] : memref<1x64xf32, #tpu.memory_space<vmem>>, vector<1x64xf32>
      %141 = vector.broadcast %140 : vector<1x64xf32> to vector<7x64xf32>
      %142 = arith.mulf %139, %141 : vector<7x64xf32>
      %c0_140 = arith.constant 0 : index
      %c0_141 = arith.constant 0 : index
      %143 = vector.load %arg9[%c0_140, %c0_141] : memref<1x64xf32, #tpu.memory_space<vmem>>, vector<1x64xf32>
      %144 = vector.broadcast %143 : vector<1x64xf32> to vector<7x64xf32>
      %145 = arith.addf %142, %144 : vector<7x64xf32>
      %c1_i32_142 = arith.constant 1 : i32
      %146 = arith.addi %61, %c1_i32_142 : i32
      %147 = arith.index_cast %146 : i32 to index
      %c1_143 = arith.constant 1 : index
      %c0_144 = arith.constant 0 : index
      %148 = vector.load %arg13[%147, %c1_143, %c0_144] : memref<9x9x64xf32, #tpu.memory_space<vmem>>, vector<1x7x64xf32>
      %149 = vector.shape_cast %148 : vector<1x7x64xf32> to vector<7x64xf32>
      %150 = vector.shape_cast %145 : vector<7x64xf32> to vector<1x7x64xf32>
      tpu.vector_store %arg13[%147, %c1_143, %c0_144], %150 {strides = array<i32>} : memref<9x9x64xf32, #tpu.memory_space<vmem>>, vector<1x7x64xf32>,
    }
    %c7_i32_38 = arith.constant 7 : i32
    %cst_39 = arith.constant 0xFF800000 : f32
    %27 = vector.broadcast %cst_39 : f32 to vector<4x4x64xf32>
    %c0_40 = arith.constant 0 : index
    %c0_41 = arith.constant 0 : index
    %c0_42 = arith.constant 0 : index
    %28 = tpu.strided_load %arg13[%c0_40, %c0_41, %c0_42] {strides = array<i32: 2, 2, 1>} : memref<9x9x64xf32, #tpu.memory_space<vmem>>, vector<4x4x64xf32>
    %29 = arith.maximumf %27, %28 : vector<4x4x64xf32>
    %c0_43 = arith.constant 0 : index
    %c1_44 = arith.constant 1 : index
    %c0_45 = arith.constant 0 : index
    %30 = tpu.strided_load %arg13[%c0_43, %c1_44, %c0_45] {strides = array<i32: 2, 2, 1>} : memref<9x9x64xf32, #tpu.memory_space<vmem>>, vector<4x4x64xf32>
    %31 = arith.maximumf %29, %30 : vector<4x4x64xf32>
    %c1_46 = arith.constant 1 : index
    %c0_47 = arith.constant 0 : index
    %c0_48 = arith.constant 0 : index
    %32 = tpu.strided_load %arg13[%c1_46, %c0_47, %c0_48] {strides = array<i32: 2, 2, 1>} : memref<9x9x64xf32, #tpu.memory_space<vmem>>, vector<4x4x64xf32>
    %33 = arith.maximumf %31, %32 : vector<4x4x64xf32>
    %c1_49 = arith.constant 1 : index
    %c1_50 = arith.constant 1 : index
    %c0_51 = arith.constant 0 : index
    %34 = tpu.strided_load %arg13[%c1_49, %c1_50, %c0_51] {strides = array<i32: 2, 2, 1>} : memref<9x9x64xf32, #tpu.memory_space<vmem>>, vector<4x4x64xf32>
    %35 = arith.maximumf %33, %34 : vector<4x4x64xf32>
    %36 = vector.extract_strided_slice %35 {offsets = [0, 0, 0], sizes = [1, 4, 64], strides = [1, 1, 1]} : vector<4x4x64xf32> to vector<1x4x64xf32>
    %37 = vector.shape_cast %36 : vector<1x4x64xf32> to vector<4x64xf32>
    %38 = arith.truncf %37 : vector<4x64xf32> to vector<4x64xbf16>
    %c0_52 = arith.constant 0 : index
    %c0_53 = arith.constant 0 : index
    %c0_54 = arith.constant 0 : index
    %39 = vector.load %arg10[%c0_52, %c0_53, %c0_54] : memref<1x16x64xbf16, #tpu.memory_space<vmem>>, vector<1x4x64xbf16>
    %40 = vector.shape_cast %39 : vector<1x4x64xbf16> to vector<4x64xbf16>
    %41 = vector.shape_cast %38 : vector<4x64xbf16> to vector<1x4x64xbf16>
    tpu.vector_store %arg10[%c0_52, %c0_53, %c0_54], %41 {strides = array<i32>} : memref<1x16x64xbf16, #tpu.memory_space<vmem>>, vector<1x4x64xbf16>,
    %42 = vector.extract_strided_slice %35 {offsets = [1, 0, 0], sizes = [1, 4, 64], strides = [1, 1, 1]} : vector<4x4x64xf32> to vector<1x4x64xf32>
    %43 = vector.shape_cast %42 : vector<1x4x64xf32> to vector<4x64xf32>
    %44 = arith.truncf %43 : vector<4x64xf32> to vector<4x64xbf16>
    %c0_55 = arith.constant 0 : index
    %c4 = arith.constant 4 : index
    %c0_56 = arith.constant 0 : index
    %45 = vector.load %arg10[%c0_55, %c4, %c0_56] : memref<1x16x64xbf16, #tpu.memory_space<vmem>>, vector<1x4x64xbf16>
    %46 = vector.shape_cast %45 : vector<1x4x64xbf16> to vector<4x64xbf16>
    %47 = vector.shape_cast %44 : vector<4x64xbf16> to vector<1x4x64xbf16>
    tpu.vector_store %arg10[%c0_55, %c4, %c0_56], %47 {strides = array<i32>} : memref<1x16x64xbf16, #tpu.memory_space<vmem>>, vector<1x4x64xbf16>,
    %48 = vector.extract_strided_slice %35 {offsets = [2, 0, 0], sizes = [1, 4, 64], strides = [1, 1, 1]} : vector<4x4x64xf32> to vector<1x4x64xf32>
    %49 = vector.shape_cast %48 : vector<1x4x64xf32> to vector<4x64xf32>
    %50 = arith.truncf %49 : vector<4x64xf32> to vector<4x64xbf16>
    %c0_57 = arith.constant 0 : index
    %c8 = arith.constant 8 : index
    %c0_58 = arith.constant 0 : index
    %51 = vector.load %arg10[%c0_57, %c8, %c0_58] : memref<1x16x64xbf16, #tpu.memory_space<vmem>>, vector<1x4x64xbf16>
    %52 = vector.shape_cast %51 : vector<1x4x64xbf16> to vector<4x64xbf16>
    %53 = vector.shape_cast %50 : vector<4x64xbf16> to vector<1x4x64xbf16>
    tpu.vector_store %arg10[%c0_57, %c8, %c0_58], %53 {strides = array<i32>} : memref<1x16x64xbf16, #tpu.memory_space<vmem>>, vector<1x4x64xbf16>,
    %54 = vector.extract_strided_slice %35 {offsets = [3, 0, 0], sizes = [1, 4, 64], strides = [1, 1, 1]} : vector<4x4x64xf32> to vector<1x4x64xf32>
    %55 = vector.shape_cast %54 : vector<1x4x64xf32> to vector<4x64xf32>
    %56 = arith.truncf %55 : vector<4x64xf32> to vector<4x64xbf16>
    %c0_59 = arith.constant 0 : index
    %c12 = arith.constant 12 : index
    %c0_60 = arith.constant 0 : index
    %57 = vector.load %arg10[%c0_59, %c12, %c0_60] : memref<1x16x64xbf16, #tpu.memory_space<vmem>>, vector<1x4x64xbf16>
    %58 = vector.shape_cast %57 : vector<1x4x64xbf16> to vector<4x64xbf16>
    %59 = vector.shape_cast %56 : vector<4x64xbf16> to vector<1x4x64xbf16>
    tpu.vector_store %arg10[%c0_59, %c12, %c0_60], %59 {strides = array<i32>} : memref<1x16x64xbf16, #tpu.memory_space<vmem>>, vector<1x4x64xbf16>,
    return
  }
  func.func @transform_0(%arg0: i32) -> (i32, i32, i32, i32) {
    %c0_i32 = arith.constant 0 : i32
    %c0_i32_0 = arith.constant 0 : i32
    %c0_i32_1 = arith.constant 0 : i32
    %c0_i32_2 = arith.constant 0 : i32
    return %arg0, %c0_i32, %c0_i32_0, %c0_i32_1 : i32, i32, i32, i32
  }
  func.func @transform_1(%arg0: i32) -> (i32, i32, i32, i32) {
    %c0_i32 = arith.constant 0 : i32
    %c0_i32_0 = arith.constant 0 : i32
    %c0_i32_1 = arith.constant 0 : i32
    %c0_i32_2 = arith.constant 0 : i32
    %c0_i32_3 = arith.constant 0 : i32
    return %c0_i32, %c0_i32_0, %c0_i32_1, %c0_i32_2 : i32, i32, i32, i32
  }
  func.func @transform_2(%arg0: i32) -> (i32, i32) {
    %c0_i32 = arith.constant 0 : i32
    %c0_i32_0 = arith.constant 0 : i32
    %c0_i32_1 = arith.constant 0 : i32
    return %c0_i32, %c0_i32_0 : i32, i32
  }
  func.func @transform_3(%arg0: i32) -> (i32, i32) {
    %c0_i32 = arith.constant 0 : i32
    %c0_i32_0 = arith.constant 0 : i32
    %c0_i32_1 = arith.constant 0 : i32
    return %c0_i32, %c0_i32_0 : i32, i32
  }
  func.func @transform_4(%arg0: i32) -> (i32, i32) {
    %c0_i32 = arith.constant 0 : i32
    %c0_i32_0 = arith.constant 0 : i32
    %c0_i32_1 = arith.constant 0 : i32
    return %c0_i32, %c0_i32_0 : i32, i32
  }
  func.func @transform_5(%arg0: i32) -> (i32, i32, i32, i32) {
    %c0_i32 = arith.constant 0 : i32
    %c0_i32_0 = arith.constant 0 : i32
    %c0_i32_1 = arith.constant 0 : i32
    %c0_i32_2 = arith.constant 0 : i32
    %c0_i32_3 = arith.constant 0 : i32
    return %c0_i32, %c0_i32_0, %c0_i32_1, %c0_i32_2 : i32, i32, i32, i32
  }
  func.func @transform_6(%arg0: i32) -> (i32, i32) {
    %c0_i32 = arith.constant 0 : i32
    %c0_i32_0 = arith.constant 0 : i32
    %c0_i32_1 = arith.constant 0 : i32
    return %c0_i32, %c0_i32_0 : i32, i32
  }
  func.func @transform_7(%arg0: i32) -> (i32, i32) {
    %c0_i32 = arith.constant 0 : i32
    %c0_i32_0 = arith.constant 0 : i32
    %c0_i32_1 = arith.constant 0 : i32
    return %c0_i32, %c0_i32_0 : i32, i32
  }
  func.func @transform_8(%arg0: i32) -> (i32, i32) {
    %c0_i32 = arith.constant 0 : i32
    %c0_i32_0 = arith.constant 0 : i32
    %c0_i32_1 = arith.constant 0 : i32
    return %c0_i32, %c0_i32_0 : i32, i32
  }
  func.func @transform_9(%arg0: i32) -> (i32, i32, i32) {
    %c0_i32 = arith.constant 0 : i32
    %c0_i32_0 = arith.constant 0 : i32
    %c0_i32_1 = arith.constant 0 : i32
    return %arg0, %c0_i32, %c0_i32_0 : i32, i32, i32
  }
}

</mosaic_0001>

<bundles_post_ra>
// kernel: tpu_custom_call.1
= control target key start
LH: loop header
LB: loop body
LE: loop exit
PB: predicated region body
PF: predicated region fallthrough
CT: control target
= control target key end

     0   :  { %14 = vsyncpa [#allocation6], 0  ;;  %s3961_s0 = inlined_call_operand.vmem [shape: bf16[2,28,28,3], index: 0, kind: input, shape index: {}]   ;;  %s3962_s1 = inlined_call_operand.vmem [shape: bf16[3,3,3,32], index: 1, kind: input, shape index: {}]   ;;  %s3963_s2 = inlined_call_operand.vmem [shape: f32[1,32], index: 2, kind: input, shape index: {}]   ;;  %s3964_s3 = inlined_call_operand.vmem [shape: f32[1,32], index: 3, kind: input, shape index: {}]   ;;  %s3965_s4 = inlined_call_operand.vmem [shape: f32[1,32], index: 4, kind: input, shape index: {}]   ;;  %s3966_s5 = inlined_call_operand.vmem [shape: bf16[3,3,32,64], index: 5, kind: input, shape index: {}]   ;;  %s3967_s6 = inlined_call_operand.vmem [shape: f32[1,64], index: 6, kind: input, shape index: {}]   ;;  %s3968_s7 = inlined_call_operand.vmem [shape: f32[1,64], index: 7, kind: input, shape index: {}]   ;;  %s3969_s8 = inlined_call_operand.vmem [shape: f32[1,64], index: 8, kind: input, shape index: {}]   ;;  %s3970_s9 = inlined_call_operand.hbm [shape: bf16[2,16,64], index: 9, kind: output, shape index: {}]  }
   0x1   :  { %16 = vsyncpa [#allocation6 + $0x1], 0  ;;  %s3338_s30 = smov 0   ;;  %s3340_s10 = smov 0  }
   0x2   :  { %s3342_s11 = smov 0   ;;  %s3344_s12 = smov 0  }
   0x3 LB: > { %s3359_s13 = sadd.s32 4294967295, %s3271_s12   ;;  %s2729_s14 = sadd.s32 4294967294, %s3271_s12   ;;  %s3271_s12 = sphi %s3344_s12, %s3980_s12   ;;  %s3267_s11 = sphi %s3342_s11, %s3979_s11   ;;  %s3263_s10 = sphi %s3340_s10, %s3978_s10   ;;  %s3259_s30 = sphi %s3338_s30, %s3977_s30  }
   0x4   : > { %s3363_s15 = sadd.s32 1, %s3271_s12   ;;  %s223_s16 = sadd.s32 1, %s3267_s11 }
   0x5   : > { %s220_s17 = ssub.s32 %s3271_s12, %s3363_s15  ;;  %p233_p0 = scmp.ne.s32.totalorder %s3267_s11, %s3263_s10 }
   0x6   : > { %p221_p1 = scmp.eq.s32.totalorder %s220_s17, 0  ;;  %p234_p2 = scmp.eq.s32.totalorder %s3359_s13, 1 }
   0x7   : > { %p239_p3 = scmp.ne.s32.totalorder %s3263_s10, %s3259_s30  ;;  %p240_p4 = scmp.eq.s32.totalorder %s2729_s14, 1 }
   0x8   : > { %s3374_s18 = scalar_select %p221_p1, %s3267_s11, %s223_s16  }
   0x9   : > { %p3376_p5 = por %p234_p2, %p233_p0  ;;  %p3380_p6 = por %p240_p4, %p239_p3 }
   0xa   : > { %p2732_p7 = scmp.ge.s32.totalorder %s3271_s12, 1  ;;  %p290_p8 = scmp.lt.s32.totalorder %s3271_s12, 3 }
   0xc   : > { %p291_p9 = pnand %p2732_p7, %p290_p8 }
   0xd   : > { %s3971_s21 = sand.u32 (!%p291_p9), 1, %s3263_s10   ;;  %p326_p10 = scmp.lt.s32.totalorder (!%p291_p9), %s3359_s13, 1 }
   0xe   : > { %294 = sbr.rel (%p291_p9) target bundleno = 718 (0x2ce), region = 56  ;;  %s3390_s22 = sshll.u32 (!%p291_p9), %s3971_s21, 3 }
   0xf   : > { %s3617_s28 = scalar_lea.vmem (!%p291_p9), [#allocation5], %s3390_s22  ;;  %s3619_s29 = smov (!%p291_p9), 0  }
  0x13   : > { %vm332_vm0 = vcmask 261120   ;;  %vm336_vm1 = vcmask 257024   ;;  %v3281_v0 = vmov -inf   ;;  %s327_s23 = scalar_select %p326_p10, %s3359_s13, 1 }
  0x14   : > { %333 = vst.msk [vmem:[#allocation2] sm:$0xff] %vm332_vm0, %v3281_v0  ;;  %334 = vst.msk [vmem:[#allocation2 + $0x8] sm:$0xff] %vm332_vm0, %v3281_v0 }
  0x15   : > { %335 = vst.msk [vmem:[#allocation2 + $0x10] sm:$0xff] %vm332_vm0, %v3281_v0  ;;  %338 = vst.msk [vmem:[#allocation2 + $0x20] sm:$0xff] %vm332_vm0, %v3281_v0  ;;  %s3105_s24 = smul.u32 448, %s327_s23 }
  0x16   : > { %339 = vst.msk [vmem:[#allocation2 + $0x28] sm:$0xff] %vm332_vm0, %v3281_v0  ;;  %340 = vst.msk [vmem:[#allocation2 + $0x30] sm:$0xff] %vm332_vm0, %v3281_v0 }
  0x17   : > { %342 = vst.msk [vmem:[#allocation2 + $0x40] sm:$0xff] %vm332_vm0, %v3281_v0  ;;  %343 = vst.msk [vmem:[#allocation2 + $0x48] sm:$0xff] %vm332_vm0, %v3281_v0  ;;  %s3614_s27 = scalar_lea.vmem %s3961_s0, %s3105_s24 }
  0x18   : > { %344 = vst.msk [vmem:[#allocation2 + $0x50] sm:$0xff] %vm332_vm0, %v3281_v0  ;;  %346 = vst.msk [vmem:[#allocation2 + $0x60] sm:$0xff] %vm332_vm0, %v3281_v0 }
  0x19   : > { %347 = vst.msk [vmem:[#allocation2 + $0x68] sm:$0xff] %vm332_vm0, %v3281_v0  ;;  %348 = vst.msk [vmem:[#allocation2 + $0x70] sm:$0xff] %vm332_vm0, %v3281_v0 }
  0x1a   : > { %350 = vst.msk [vmem:[#allocation2 + $0x80] sm:$0xff] %vm332_vm0, %v3281_v0  ;;  %351 = vst.msk [vmem:[#allocation2 + $0x88] sm:$0xff] %vm332_vm0, %v3281_v0 }
  0x1b   : > { %352 = vst.msk [vmem:[#allocation2 + $0x90] sm:$0xff] %vm332_vm0, %v3281_v0  ;;  %354 = vst.msk [vmem:[#allocation2 + $0xa0] sm:$0xff] %vm332_vm0, %v3281_v0 }
  0x1c   : > { %355 = vst.msk [vmem:[#allocation2 + $0xa8] sm:$0xff] %vm332_vm0, %v3281_v0  ;;  %356 = vst.msk [vmem:[#allocation2 + $0xb0] sm:$0xff] %vm332_vm0, %v3281_v0 }
  0x1d   : > { %358 = vst.msk [vmem:[#allocation2 + $0xc0] sm:$0xff] %vm332_vm0, %v3281_v0  ;;  %359 = vst.msk [vmem:[#allocation2 + $0xc8] sm:$0xff] %vm332_vm0, %v3281_v0 }
  0x1e   : > { %360 = vst.msk [vmem:[#allocation2 + $0xd0] sm:$0xff] %vm332_vm0, %v3281_v0  ;;  %362 = vst.msk [vmem:[#allocation2 + $0xe0] sm:$0xff] %vm332_vm0, %v3281_v0 }
  0x1f   : > { %363 = vst.msk [vmem:[#allocation2 + $0xe8] sm:$0xff] %vm332_vm0, %v3281_v0  ;;  %364 = vst.msk [vmem:[#allocation2 + $0xf0] sm:$0xff] %vm332_vm0, %v3281_v0 }
  0x20   : > { %366 = vst.msk [vmem:[#allocation2 + $0x100] sm:$0xff] %vm332_vm0, %v3281_v0  ;;  %367 = vst.msk [vmem:[#allocation2 + $0x108] sm:$0xff] %vm332_vm0, %v3281_v0 }
  0x21   : > { %368 = vst.msk [vmem:[#allocation2 + $0x110] sm:$0xff] %vm332_vm0, %v3281_v0  ;;  %370 = vst.msk [vmem:[#allocation2 + $0x120] sm:$0xff] %vm332_vm0, %v3281_v0 }
  0x22   : > { %371 = vst.msk [vmem:[#allocation2 + $0x128] sm:$0xff] %vm332_vm0, %v3281_v0  ;;  %372 = vst.msk [vmem:[#allocation2 + $0x130] sm:$0xff] %vm332_vm0, %v3281_v0 }
  0x23   : > { %374 = vst.msk [vmem:[#allocation2 + $0x140] sm:$0xff] %vm332_vm0, %v3281_v0  ;;  %375 = vst.msk [vmem:[#allocation2 + $0x148] sm:$0xff] %vm332_vm0, %v3281_v0 }
  0x24   : > { %376 = vst.msk [vmem:[#allocation2 + $0x150] sm:$0xff] %vm332_vm0, %v3281_v0  ;;  %378 = vst.msk [vmem:[#allocation2 + $0x160] sm:$0xff] %vm332_vm0, %v3281_v0 }
  0x25   : > { %379 = vst.msk [vmem:[#allocation2 + $0x168] sm:$0xff] %vm332_vm0, %v3281_v0  ;;  %380 = vst.msk [vmem:[#allocation2 + $0x170] sm:$0xff] %vm332_vm0, %v3281_v0 }
  0x26   : > { %382 = vst.msk [vmem:[#allocation2 + $0x180] sm:$0xff] %vm332_vm0, %v3281_v0  ;;  %383 = vst.msk [vmem:[#allocation2 + $0x188] sm:$0xff] %vm332_vm0, %v3281_v0 }
  0x27   : > { %384 = vst.msk [vmem:[#allocation2 + $0x190] sm:$0xff] %vm332_vm0, %v3281_v0  ;;  %386 = vst.msk [vmem:[#allocation2 + $0x1a0] sm:$0xff] %vm332_vm0, %v3281_v0 }
  0x28   : > { %387 = vst.msk [vmem:[#allocation2 + $0x1a8] sm:$0xff] %vm332_vm0, %v3281_v0  ;;  %388 = vst.msk [vmem:[#allocation2 + $0x1b0] sm:$0xff] %vm332_vm0, %v3281_v0 }
  0x29   : > { %390 = vst.msk [vmem:[#allocation2 + $0x1c0] sm:$0xff] %vm332_vm0, %v3281_v0  ;;  %391 = vst.msk [vmem:[#allocation2 + $0x1c8] sm:$0xff] %vm332_vm0, %v3281_v0 }
  0x2a   : > { %392 = vst.msk [vmem:[#allocation2 + $0x1d0] sm:$0xff] %vm332_vm0, %v3281_v0  ;;  %394 = vst.msk [vmem:[#allocation2 + $0x1e0] sm:$0xff] %vm332_vm0, %v3281_v0 }
  0x2b   : > { %395 = vst.msk [vmem:[#allocation2 + $0x1e8] sm:$0xff] %vm332_vm0, %v3281_v0  ;;  %396 = vst.msk [vmem:[#allocation2 + $0x1f0] sm:$0xff] %vm332_vm0, %v3281_v0 }
  0x2c   : > { %398 = vst.msk [vmem:[#allocation2 + $0x200] sm:$0xff] %vm332_vm0, %v3281_v0  ;;  %399 = vst.msk [vmem:[#allocation2 + $0x208] sm:$0xff] %vm332_vm0, %v3281_v0 }
  0x2d   : > { %400 = vst.msk [vmem:[#allocation2 + $0x210] sm:$0xff] %vm332_vm0, %v3281_v0  ;;  %402 = vst.msk [vmem:[#allocation2 + $0x220] sm:$0xff] %vm332_vm0, %v3281_v0 }
  0x2e   : > { %403 = vst.msk [vmem:[#allocation2 + $0x228] sm:$0xff] %vm332_vm0, %v3281_v0  ;;  %404 = vst.msk [vmem:[#allocation2 + $0x230] sm:$0xff] %vm332_vm0, %v3281_v0 }
  0x2f   : > { %406 = vst.msk [vmem:[#allocation2 + $0x240] sm:$0xff] %vm332_vm0, %v3281_v0  ;;  %407 = vst.msk [vmem:[#allocation2 + $0x248] sm:$0xff] %vm332_vm0, %v3281_v0 }
  0x30   : > { %408 = vst.msk [vmem:[#allocation2 + $0x250] sm:$0xff] %vm332_vm0, %v3281_v0  ;;  %410 = vst.msk [vmem:[#allocation2 + $0x260] sm:$0xff] %vm332_vm0, %v3281_v0 }
  0x31   : > { %411 = vst.msk [vmem:[#allocation2 + $0x268] sm:$0xff] %vm332_vm0, %v3281_v0  ;;  %412 = vst.msk [vmem:[#allocation2 + $0x270] sm:$0xff] %vm332_vm0, %v3281_v0 }
  0x32   : > { %414 = vst.msk [vmem:[#allocation2 + $0x280] sm:$0xff] %vm332_vm0, %v3281_v0  ;;  %415 = vst.msk [vmem:[#allocation2 + $0x288] sm:$0xff] %vm332_vm0, %v3281_v0 }
  0x33   : > { %416 = vst.msk [vmem:[#allocation2 + $0x290] sm:$0xff] %vm332_vm0, %v3281_v0  ;;  %418 = vst.msk [vmem:[#allocation2 + $0x2a0] sm:$0xff] %vm332_vm0, %v3281_v0 }
  0x34   : > { %419 = vst.msk [vmem:[#allocation2 + $0x2a8] sm:$0xff] %vm332_vm0, %v3281_v0  ;;  %420 = vst.msk [vmem:[#allocation2 + $0x2b0] sm:$0xff] %vm332_vm0, %v3281_v0 }
  0x35   : > { %422 = vst.msk [vmem:[#allocation2 + $0x2c0] sm:$0xff] %vm332_vm0, %v3281_v0  ;;  %423 = vst.msk [vmem:[#allocation2 + $0x2c8] sm:$0xff] %vm332_vm0, %v3281_v0 }
  0x36   : > { %424 = vst.msk [vmem:[#allocation2 + $0x2d0] sm:$0xff] %vm332_vm0, %v3281_v0  ;;  %426 = vst.msk [vmem:[#allocation2 + $0x2e0] sm:$0xff] %vm332_vm0, %v3281_v0 }
  0x37   : > { %427 = vst.msk [vmem:[#allocation2 + $0x2e8] sm:$0xff] %vm332_vm0, %v3281_v0  ;;  %428 = vst.msk [vmem:[#allocation2 + $0x2f0] sm:$0xff] %vm332_vm0, %v3281_v0 }
  0x38   : > { %430 = vst.msk [vmem:[#allocation2 + $0x300] sm:$0xff] %vm332_vm0, %v3281_v0  ;;  %431 = vst.msk [vmem:[#allocation2 + $0x308] sm:$0xff] %vm332_vm0, %v3281_v0 }
  0x39   : > { %432 = vst.msk [vmem:[#allocation2 + $0x310] sm:$0xff] %vm332_vm0, %v3281_v0  ;;  %434 = vst.msk [vmem:[#allocation2 + $0x320] sm:$0xff] %vm332_vm0, %v3281_v0 }
  0x3a   : > { %435 = vst.msk [vmem:[#allocation2 + $0x328] sm:$0xff] %vm332_vm0, %v3281_v0  ;;  %436 = vst.msk [vmem:[#allocation2 + $0x330] sm:$0xff] %vm332_vm0, %v3281_v0 }
  0x3b   : > { %438 = vst.msk [vmem:[#allocation2 + $0x340] sm:$0xff] %vm332_vm0, %v3281_v0  ;;  %439 = vst.msk [vmem:[#allocation2 + $0x348] sm:$0xff] %vm332_vm0, %v3281_v0 }
  0x3c   : > { %440 = vst.msk [vmem:[#allocation2 + $0x350] sm:$0xff] %vm332_vm0, %v3281_v0 }
  0x3d   : > { %337 = vst.msk [vmem:[#allocation2 + $0x18] sm:$0xf] %vm336_vm1, %v3281_v0  ;;  %341 = vst.msk [vmem:[#allocation2 + $0x38] sm:$0xf] %vm336_vm1, %v3281_v0 }
  0x3e   : > { %345 = vst.msk [vmem:[#allocation2 + $0x58] sm:$0xf] %vm336_vm1, %v3281_v0  ;;  %349 = vst.msk [vmem:[#allocation2 + $0x78] sm:$0xf] %vm336_vm1, %v3281_v0 }
  0x3f   : > { %353 = vst.msk [vmem:[#allocation2 + $0x98] sm:$0xf] %vm336_vm1, %v3281_v0  ;;  %357 = vst.msk [vmem:[#allocation2 + $0xb8] sm:$0xf] %vm336_vm1, %v3281_v0 }
  0x40   : > { %361 = vst.msk [vmem:[#allocation2 + $0xd8] sm:$0xf] %vm336_vm1, %v3281_v0  ;;  %365 = vst.msk [vmem:[#allocation2 + $0xf8] sm:$0xf] %vm336_vm1, %v3281_v0 }
  0x41   : > { %369 = vst.msk [vmem:[#allocation2 + $0x118] sm:$0xf] %vm336_vm1, %v3281_v0  ;;  %373 = vst.msk [vmem:[#allocation2 + $0x138] sm:$0xf] %vm336_vm1, %v3281_v0 }
  0x42   : > { %377 = vst.msk [vmem:[#allocation2 + $0x158] sm:$0xf] %vm336_vm1, %v3281_v0  ;;  %381 = vst.msk [vmem:[#allocation2 + $0x178] sm:$0xf] %vm336_vm1, %v3281_v0 }
  0x43   : > { %385 = vst.msk [vmem:[#allocation2 + $0x198] sm:$0xf] %vm336_vm1, %v3281_v0  ;;  %389 = vst.msk [vmem:[#allocation2 + $0x1b8] sm:$0xf] %vm336_vm1, %v3281_v0 }
  0x44   : > { %393 = vst.msk [vmem:[#allocation2 + $0x1d8] sm:$0xf] %vm336_vm1, %v3281_v0  ;;  %397 = vst.msk [vmem:[#allocation2 + $0x1f8] sm:$0xf] %vm336_vm1, %v3281_v0 }
  0x45   : > { %401 = vst.msk [vmem:[#allocation2 + $0x218] sm:$0xf] %vm336_vm1, %v3281_v0  ;;  %405 = vst.msk [vmem:[#allocation2 + $0x238] sm:$0xf] %vm336_vm1, %v3281_v0 }
  0x46   : > { %409 = vst.msk [vmem:[#allocation2 + $0x258] sm:$0xf] %vm336_vm1, %v3281_v0  ;;  %413 = vst.msk [vmem:[#allocation2 + $0x278] sm:$0xf] %vm336_vm1, %v3281_v0 }
  0x47   : > { %417 = vst.msk [vmem:[#allocation2 + $0x298] sm:$0xf] %vm336_vm1, %v3281_v0  ;;  %421 = vst.msk [vmem:[#allocation2 + $0x2b8] sm:$0xf] %vm336_vm1, %v3281_v0 }
  0x48   : > { %425 = vst.msk [vmem:[#allocation2 + $0x2d8] sm:$0xf] %vm336_vm1, %v3281_v0  ;;  %429 = vst.msk [vmem:[#allocation2 + $0x2f8] sm:$0xf] %vm336_vm1, %v3281_v0 }
  0x49   : > { %433 = vst.msk [vmem:[#allocation2 + $0x318] sm:$0xf] %vm336_vm1, %v3281_v0  ;;  %437 = vst.msk [vmem:[#allocation2 + $0x338] sm:$0xf] %vm336_vm1, %v3281_v0 }
  0x4a   : > { %441 = vst.msk [vmem:[#allocation2 + $0x358] sm:$0xf] %vm336_vm1, %v3281_v0 }
  0x4b LB: >> { %v2737_v1 = vld [vmem:[%s3962_s1 + $0x2] sm:$0x3]  ;;  %vm496_vm2 = vcmask 1040384   ;;  %vm497_vm3 = vcmask 1041408   ;;  %v3282_v2 = vmov 65535   ;;  %s2902_s23 = sshll.u32 %s3275_s29, 4  ;;  %s3275_s29 = sphi %s3619_s29, %s451_s29  }
  0x4c   : >> { %v498_v3 = vsel %vm496_vm2, 4294967295, %v3282_v2  ;;  %v459_v4 = vld [vmem:[%s3962_s1] sm:$0x3]  ;;  %v2745_v6 = vld [vmem:[%s3962_s1 + $0x4] sm:$0x3]  ;;  %s3642_s14 = scalar_lea.vmem %s3614_s27, %s2902_s23  ;;  %vm489_vm4 = vcmask 23552  }
  0x4d   : >> { %v3630_v5 = vsel %vm497_vm3, %v498_v3, 0  ;;  %v2754_v7 = vld [vmem:[%s3962_s1 + $0x6] sm:$0x3]  ;;  %v2765_v11 = vld [vmem:[%s3962_s1 + $0xa] sm:$0x3]  ;;  %vm618_vm6 = vcmask 1046528  }
  0x4e   : >> { %v501_v8 = vand.u32 %v2737_v1, %v3630_v5  ;;  %v561_v9 = vand.u32 %v3630_v5, %v459_v4  ;;  %v3645_v10 = vand.u32 %v2745_v6, %v3630_v5  ;;  %v455_v12 = vld [vmem:[%s3642_s14] sm:$0xf]  ;;  %v456_v13 = vld [vmem:[%s3642_s14 + $0x4] sm:$0xf]  ;;  %v457_v14 = vld [vmem:[%s3642_s14 + $0x8] sm:$0xf]  ;;  %v711_v15 = vand.u32 %v2754_v7, %v3630_v5 }
  0x4f   : >> { %v460_v16 = vld [vmem:[%s3642_s14 + $0xc] sm:$0x3]  ;;  %v2738_v17 = vcombine.low %v455_v12, %v456_v13  ;;  %v612_v19 = vld [vmem:[%s3642_s14] sm:$0xe]  ;;  %v2760_v20 = vld [vmem:[%s3962_s1 + $0x8] sm:$0x3]  ;;  %v864_v31 = vand.u32 %v2765_v11, %v3630_v5 }
  0x50   : >> { %2979 = vmatprep.subr.bf16.mxu0 %v501_v8  ;;  %2985 = vmatprep.subr.bf16.mxu1 %v561_v9  ;;  %v458_v18 = vld [vmem:[%s3642_s14 + $0xc] sm:$0x1]  ;;  %v3660_v21 = vcombine.low %v457_v14, %v460_v16  ;;  %v2746_v23 = vcombine.low %v612_v19, %v456_v13  ;;  %v2750_v24 = vld [vmem:[%s3642_s14 + $0x10] sm:$0xf]  ;;  %v2751_v25 = vld [vmem:[%s3642_s14 + $0x14] sm:$0xf]  ;;  %v793_v42 = vand.u32 %v2760_v20, %v3630_v5 }
  0x51   : >> { %2980 = vmatpush3.bf16.msra.mxu0 %v501_v8  ;;  %2986 = vmatpush3.bf16.msra.mxu1 %v561_v9  ;;  %v2742_v22 = vcombine.low %v457_v14, %v458_v18  ;;  %v2752_v26 = vld [vmem:[%s3642_s14 + $0x18] sm:$0xf]  ;;  %v475_v27 = vshrl.u32 %v2738_v17, 16  ;;  %v477_v28 = vshll.u32 %v2738_v17, 16  ;;  %v2755_v29 = vcombine.low %v2750_v24, %v2751_v25  ;;  %v2753_v30 = vld [vmem:[%s3642_s14 + $0x1c] sm:$0x1] }
  0x52   : >> { %2987 = vmatprep.mubr.msk.bf16.mxu1 %vm489_vm4, %v2738_v17  ;;  %2991 = vmatprep.subr.bf16.mxu0 %v3645_v10  ;;  %v2759_v32 = vld [vmem:[%s3642_s14 + $0x1c] sm:$0x3]  ;;  %v482_v33 = vshll.u32 %v3660_v21, 16  ;;  %v486_v34 = vshrl.u32 %v3660_v21, 16  ;;  %v619_v35 = vrot.slane %v2746_v23, 1  ;;  %v620_v36 = vrot.slane %v3660_v21, 1 }
  0x53   : >> { %2997 = vmatprep.subr.bf16.mxu1 %v711_v15  ;;  %v2764_v37 = vld [vmem:[%s3642_s14 + $0x10] sm:$0xe]  ;;  %vm473_vm5 = vsmask.f32 7424  ;;  %v479_v38 = vrot.slane %v477_v28, 1  ;;  %v2761_v39 = vcombine.low %v2752_v26, %v2759_v32  ;;  %v774_v43 = vshll.u32 %v2755_v29, 16 }
  0x54   : >> { %2988 = vmatmul.mubr.msk.bf16.vlgmr.msra.gmra.mxu1 %vm489_vm4, %v2742_v22  ;;  %v2770_v40 = vld [vmem:[%s3642_s14 + $0x20] sm:$0xf]  ;;  %v484_v41 = vrot.slane %v482_v33, 1  ;;  %v2766_v44 = vcombine.low %v2764_v37, %v2751_v25  ;;  %v2771_v45 = vld [vmem:[%s3642_s14 + $0x24] sm:$0xf]  ;;  %v2756_v48 = vcombine.low %v2752_v26, %v2753_v30  ;;  %v772_v49 = vshrl.u32 %v2755_v29, 16 }
  0x55   : >> { %2998 = vmatpush3.bf16.msra.mxu1 %v711_v15  ;;  %2999 = vmatprep.mubr.msk.bf16.mxu1 %vm489_vm4, %v2755_v29  ;;  %v3680_v46 = vld [vmem:[%s3642_s14 + $0x28] sm:$0xf]  ;;  %v480_v47 = vor.u32 %v479_v38, %v475_v27  ;;  %v855_v50 = vrot.slane %v2761_v39, 1  ;;  %v2780_v51 = vld [vmem:[%s3962_s1 + $0xe] sm:$0x3]  ;;  %v621_v54 = vsel %vm618_vm6, %v619_v35, %v620_v36  ;;  %v779_v55 = vshll.u32 %v2761_v39, 16 }
  0x56   : >> { %3009 = vmatprep.subr.bf16.mxu1 %v864_v31  ;;  %v2779_v52 = vld [vmem:[%s3642_s14 + $0x2c] sm:$0x3]  ;;  %v488_v53 = vor.u32 %v486_v34, %v484_v41  ;;  %v854_v56 = vrot.slane %v2766_v44, 1  ;;  %v776_v58 = vrot.slane %v774_v43, 1  ;;  %v2775_v59 = vcombine.low %v2770_v40, %v2771_v45  ;;  %v2785_v15 = vld [vmem:[%s3962_s1 + $0x10] sm:$0x3] }
  0x57   : >> { %v485_v57 = vsel %vm473_vm5, %v480_v47, %v484_v41  ;;  %v2781_v60 = vcombine.low %v3680_v46, %v2779_v52  ;;  %v1028_v61 = vand.u32 %v2780_v51, %v3630_v5  ;;  %v781_v4 = vrot.slane %v779_v55, 1  ;;  %v2774_v7 = vld [vmem:[%s3962_s1 + $0xc] sm:$0x3]  ;;  %v2784_v16 = vld [vmem:[%s3642_s14 + $0x20] sm:$0xe]  ;;  %s2792_s24 = sshll.u32 %s3275_s29, 5 }
  0x58   : >> { %2981 = vmatprep.mubr.msk.bf16.mxu0 %vm489_vm4, %v485_v57  ;;  %v856_v62 = vsel %vm618_vm6, %v854_v56, %v855_v50  ;;  %v1007_v63 = vshrl.u32 %v2775_v59, 16  ;;  %v1009_v1 = vshll.u32 %v2775_v59, 16  ;;  %v777_v3 = vor.u32 %v776_v58, %v772_v49  ;;  %v2773_v21 = vld [vmem:[%s3642_s14 + $0x2c] sm:$0x1]  ;;  %s2564_s16 = scalar_lea.vmem [#allocation2], %s2792_s24  ;;  %s451_s29 = sadd.s32 1, %s3275_s29  }
  0x59   : >> { %2982 = vmatmul.mubr.msk.bf16.vlgmr.msra.gmra.mxu0 %vm489_vm4, %v488_v53  ;;  %v1014_v2 = vshll.u32 %v2781_v60, 16  ;;  %v946_v11 = vand.u32 %v2774_v7, %v3630_v5  ;;  %v783_v12 = vshrl.u32 %v2761_v39, 16  ;;  %v1018_v14 = vshrl.u32 %v2781_v60, 16  ;;  %p448_p11 = scmp.ge.s32.totalorder %s451_s29, 26  }
  0x5a   : >> { %2992 = vmatpush3.bf16.msra.mxu0 %v3645_v10  ;;  %2993 = vmatprep.mubr.msk.bf16.mxu0 %vm489_vm4, %v621_v54  ;;  %v1011_v6 = vrot.slane %v1009_v1, 1  ;;  %v782_v10 = vsel %vm473_vm5, %v777_v3, %v781_v4  ;;  %v1099_v19 = vand.u32 %v2785_v15, %v3630_v5  ;;  %v2786_v20 = vcombine.low %v2784_v16, %v2771_v45  ;;  %s3778_s27 = smov (%p448_p11), 0  }
  0x5b   : >> { %3003 = vmatprep.subr.bf16.mxu0 %v793_v42  ;;  %v1016_v9 = vrot.slane %v1014_v2, 1  ;;  %v785_v17 = vor.u32 %v783_v12, %v781_v4  ;;  %v1090_v23 = vrot.slane %v2781_v60, 1  ;;  %v2776_v24 = vcombine.low %v3680_v46, %v2773_v21 }
  0x5c   : >> { %3000 = vmatmul.mubr.msk.bf16.vlgmr.msra.gmra.mxu1 %vm489_vm4, %v2756_v48  ;;  %v1012_v8 = vor.u32 %v1011_v6, %v1007_v63  ;;  %v1089_v22 = vrot.slane %v2786_v20, 1  ;;  %vm1196_vm7 = vcmask 254976   ;;  %vm1776_vm8 = vcmask (%p448_p11), 523264  }
  0x5d   : >> { %3010 = vmatpush3.bf16.msra.mxu1 %v864_v31  ;;  %3011 = vmatprep.mubr.msk.bf16.mxu1 %vm489_vm4, %v856_v62  ;;  %v1020_v18 = vor.u32 %v1018_v14, %v1016_v9  ;;  %1777 = vst.msk [vmem:[#allocation4] sm:$0xff] (%p448_p11), %vm1776_vm8, %v3281_v0  ;;  %1780 = vst.msk [vmem:[#allocation4 + $0x10] sm:$0xff] (%p448_p11), %vm1776_vm8, %v3281_v0  ;;  %vm1739_vm9 = vsmask.f32 (%p448_p11), 256  ;;  %vm1738_vm10 = vcmask (%p448_p11), 253952  }
  0x5e   : >> { %3021 = vmatprep.subr.bf16.mxu1 %v1028_v61  ;;  %v1017_v13 = vsel %vm473_vm5, %v1012_v8, %v1016_v9  ;;  %v1091_v25 = vsel %vm618_vm6, %v1089_v22, %v1090_v23  ;;  %1782 = vst.msk [vmem:[#allocation4 + $0x20] sm:$0xff] (%p448_p11), %vm1776_vm8, %v3281_v0  ;;  %1784 = vst.msk [vmem:[#allocation4 + $0x30] sm:$0xff] (%p448_p11), %vm1776_vm8, %v3281_v0 }
  0x5f   : > { %1786 = vst.msk [vmem:[#allocation4 + $0x40] sm:$0xff] (%p448_p11), %vm1776_vm8, %v3281_v0  ;;  %1788 = vst.msk [vmem:[#allocation4 + $0x50] sm:$0xff] (%p448_p11), %vm1776_vm8, %v3281_v0 }
  0x60   : > { %1790 = vst.msk [vmem:[#allocation4 + $0x60] sm:$0xff] (%p448_p11), %vm1776_vm8, %v3281_v0  ;;  %1792 = vst.msk [vmem:[#allocation4 + $0x70] sm:$0xff] (%p448_p11), %vm1776_vm8, %v3281_v0 }
  0x61   : >> { %2994 = vmatmul.mubr.msk.bf16.vlgmr.msra.gmra.mxu0 %vm489_vm4, %v620_v36  ;;  %vm3748_vm11 = vmand (%p448_p11), %vm1738_vm10, %vm1739_vm9 }
  0x62   : >> { %3004 = vmatpush3.bf16.msra.mxu0 %v793_v42  ;;  %3005 = vmatprep.mubr.msk.bf16.mxu0 %vm489_vm4, %v782_v10 }
  0x63   : >> { %3015 = vmatprep.subr.bf16.mxu0 %v946_v11 }
  0x64   : >> { %3012 = vmatmul.mubr.msk.bf16.vlgmr.msra.gmra.mxu1 %vm489_vm4, %v855_v50 }
  0x65   : >> { %3022 = vmatpush3.bf16.msra.mxu1 %v1028_v61  ;;  %3023 = vmatprep.mubr.msk.bf16.mxu1 %vm489_vm4, %v1017_v13 }
  0x69   : >> { %3006 = vmatmul.mubr.msk.bf16.vlgmr.msra.gmra.mxu0 %vm489_vm4, %v785_v17 }
  0x6a   : >> { %3016 = vmatpush3.bf16.msra.mxu0 %v946_v11  ;;  %3017 = vmatprep.mubr.msk.bf16.mxu0 %vm489_vm4, %v2775_v59 }
  0x6b   : >> { %3027 = vmatprep.subr.bf16.mxu0 %v1099_v19 }
  0x6c   : >> { %3024 = vmatmul.mubr.msk.bf16.vlgmr.msra.gmra.mxu1 %vm489_vm4, %v1020_v18 }
  0x71   : >> { %3018 = vmatmul.mubr.msk.bf16.vlgmr.msra.gmra.mxu0 %vm489_vm4, %v2776_v24 }
  0x72   : >> { %3028 = vmatpush3.bf16.msra.mxu0 %v1099_v19  ;;  %3029 = vmatprep.mubr.msk.bf16.mxu0 %vm489_vm4, %v1091_v25  ;;  %v2789_v19 = vld [vmem:[%s3963_s2] ss:$0 sm:$0xff] }
  0x79   : >> { %3030 = vmatmul.mubr.msk.bf16.vlgmr.msra.gmra.mxu0 %vm489_vm4, %v1090_v23 }
 0x114   : >> { %v2989_v5 = vpop.f32.mrf.mxu1 }
 0x116   : >> { %v597_v26 = vpop.f32.mrf.mxu1 }
 0x118   : >> { %v2990_v27 = vpop.f32.mrf.mxu1 }
 0x119   : >> { %v2983_v28 = vpop.f32.mrf.mxu0 }
 0x11a   : >> { %v600_v29 = vpop.f32.mrf.mxu1  ;;  %v606_v42 = vadd.f32 %v2989_v5, %v2983_v28 }
 0x11b   : >> { %v537_v30 = vpop.f32.mrf.mxu0 }
 0x11c   : >> { %v3001_v31 = vpop.f32.mrf.mxu1  ;;  %v598_v44 = vadd.f32 %v597_v26, %v537_v30 }
 0x11d   : >> { %v2984_v32 = vpop.f32.mrf.mxu0 }
 0x11e   : >> { %v747_v33 = vpop.f32.mrf.mxu1  ;;  %v609_v48 = vadd.f32 %v2990_v27, %v2984_v32  ;;  %v2790_v27 = vld [vmem:[%s3964_s3] ss:$0 sm:$0xff] }
 0x11f   : >> { %v540_v34 = vpop.f32.mrf.mxu0 }
 0x120   : >> { %v3002_v35 = vpop.f32.mrf.mxu1  ;;  %v601_v51 = vadd.f32 %v600_v29, %v540_v34 }
 0x121   : >> { %v2995_v36 = vpop.f32.mrf.mxu0 }
 0x122   : >> { %v750_v37 = vpop.f32.mrf.mxu1  ;;  %v682_v45 = vadd.f32 %v2995_v36, %v606_v42 }
 0x123   : >> { %v665_v38 = vpop.f32.mrf.mxu0 }
 0x124   : >> { %v3013_v39 = vpop.f32.mrf.mxu1  ;;  %v680_v49 = vadd.f32 %v665_v38, %v598_v44  ;;  %v764_v52 = vadd.f32 %v3001_v31, %v682_v45 }
 0x125   : >> { %v2996_v40 = vpop.f32.mrf.mxu0 }
 0x126   : >> { %v900_v41 = vpop.f32.mrf.mxu1  ;;  %v683_v53 = vadd.f32 %v2996_v40, %v609_v48  ;;  %v762_v56 = vadd.f32 %v747_v33, %v680_v49  ;;  %v2791_v33 = vld [vmem:[%s3965_s4] ss:$0 sm:$0xff] }
 0x127   : >> { %v668_v43 = vpop.f32.mrf.mxu0 }
 0x128   : >> { %v3014_v47 = vpop.f32.mrf.mxu1  ;;  %v681_v57 = vadd.f32 %v668_v43, %v601_v51  ;;  %v765_v60 = vadd.f32 %v3002_v35, %v683_v53 }
 0x129   : >> { %v3007_v46 = vpop.f32.mrf.mxu0 }
 0x12a   : >> { %v903_v55 = vpop.f32.mrf.mxu1  ;;  %v846_v58 = vadd.f32 %v3007_v46, %v764_v52  ;;  %v763_v1 = vadd.f32 %v750_v37, %v681_v57 }
 0x12b   : >> { %v829_v50 = vpop.f32.mrf.mxu0 }
 0x12c   : >> { %v844_v61 = vadd.f32 %v829_v50, %v762_v56  ;;  %v3025_v63 = vpop.f32.mrf.mxu1  ;;  %v917_v2 = vadd.f32 %v3013_v39, %v846_v58 }
 0x12d   : >> { %v3008_v54 = vpop.f32.mrf.mxu0 }
 0x12e   : >> { %v847_v3 = vadd.f32 %v3008_v54, %v765_v60  ;;  %v915_v6 = vadd.f32 %v900_v41, %v844_v61  ;;  %v1064_v9 = vpop.f32.mrf.mxu1 }
 0x12f   : >> { %v832_v59 = vpop.f32.mrf.mxu0 }
 0x130   : >> { %v845_v7 = vadd.f32 %v832_v59, %v763_v1  ;;  %v918_v11 = vadd.f32 %v3014_v47, %v847_v3  ;;  %v3026_v17 = vpop.f32.mrf.mxu1 }
 0x131   : >> { %v3019_v62 = vpop.f32.mrf.mxu0 }
 0x132   : >> { %v999_v8 = vadd.f32 %v3019_v62, %v917_v2  ;;  %v916_v14 = vadd.f32 %v903_v55, %v845_v7  ;;  %v1067_v26 = vpop.f32.mrf.mxu1 }
 0x133   : >> { %v982_v4 = vpop.f32.mrf.mxu0 }
 0x134   : >> { %v997_v12 = vadd.f32 %v982_v4, %v915_v6  ;;  %v1081_v15 = vadd.f32 %v3025_v63, %v999_v8 }
 0x135   : >> { %v3020_v10 = vpop.f32.mrf.mxu0 }
 0x136   : >> { %v1000_v16 = vadd.f32 %v3020_v10, %v918_v11  ;;  %v1079_v20 = vadd.f32 %v1064_v9, %v997_v12 }
 0x137   : >> { %v985_v13 = vpop.f32.mrf.mxu0 }
 0x138   : >> { %v998_v21 = vadd.f32 %v985_v13, %v916_v14  ;;  %v1082_v24 = vadd.f32 %v3026_v17, %v1000_v16 }
 0x139   : >> { %v3031_v18 = vpop.f32.mrf.mxu0 }
 0x13a   : >> { %v1152_v22 = vadd.f32 %v3031_v18, %v1081_v15  ;;  %v1080_v29 = vadd.f32 %v1067_v26, %v998_v21 }
 0x13b   : >> { %v1135_v23 = vpop.f32.mrf.mxu0 }
 0x13c   : >> { %v1163_v25 = vadd.f32 %v2789_v19, %v1152_v22  ;;  %v1150_v5 = vadd.f32 %v1135_v23, %v1079_v20 }
 0x13d   : >> { %v3032_v28 = vpop.f32.mrf.mxu0 }
 0x13e   : >> { %v1167_v30 = vmax.f32 %v1163_v25, 0.0  ;;  %v1161_v31 = vadd.f32 %v2789_v19, %v1150_v5  ;;  %v1153_v32 = vadd.f32 %v3032_v28, %v1082_v24 }
 0x13f   : >> { %v1138_v34 = vpop.f32.mrf.mxu0 }
 0x140   : >> { %v1178_v35 = vmul.f32 %v2790_v27, %v1167_v30  ;;  %v1165_v36 = vmax.f32 %v1161_v31, 0.0  ;;  %v1164_v37 = vadd.f32 %v2789_v19, %v1153_v32  ;;  %v1151_v38 = vadd.f32 %v1138_v34, %v1080_v29 }
 0x142   : >> { %v1189_v39 = vadd.f32 %v2791_v33, %v1178_v35  ;;  %v1176_v40 = vmul.f32 %v2790_v27, %v1165_v36  ;;  %v1168_v41 = vmax.f32 %v1164_v37, 0.0  ;;  %v1162_v42 = vadd.f32 %v2789_v19, %v1151_v38  ;;  %v1741_v37 = vld [vmem:[#allocation3 + $0x4] sm:$0x1] (%p448_p11) }
 0x144   : >> { %2795 = vst.msk [vmem:[%s2564_s16 + $0x31] sm:$0xff] %vm332_vm0, %v1189_v39  ;;  %v1187_v43 = vadd.f32 %v2791_v33, %v1176_v40  ;;  %v1179_v44 = vmul.f32 %v2790_v27, %v1168_v41  ;;  %v1166_v45 = vmax.f32 %v1162_v42, 0.0 }
 0x146   : >> { %2793 = vst.msk [vmem:[%s2564_s16 + $0x21] sm:$0xff] %vm332_vm0, %v1187_v43  ;;  %v1190_v46 = vadd.f32 %v2791_v33, %v1179_v44  ;;  %v1177_v47 = vmul.f32 %v2790_v27, %v1166_v45  ;;  %450 = sbr.rel (!%p448_p11) target bundleno = 75 (0x4b), region = 305 }
 0x148   : >> { %2796 = vst.msk [vmem:[%s2564_s16 + $0x39] sm:$0x3] %vm1196_vm7, %v1190_v46  ;;  %v1188_v48 = vadd.f32 %v2791_v33, %v1177_v47 }
 0x14a   : >> { %2794 = vst.msk [vmem:[%s2564_s16 + $0x29] sm:$0xff] %vm332_vm0, %v1188_v48 }
 0x151   : > { %v1198_v49 = vld [vmem:[#allocation2] ss:$3 sm:$0xff]  ;;  %v1234_v50 = vld [vmem:[#allocation2 + $0x1] ss:$3 sm:$0xff]  ;;  %v1288_v51 = vld [vmem:[#allocation2 + $0x2] ss:$3 sm:$0xff] }
 0x152   : > { %v1269_v52 = vmax.f32 %v1198_v49, %v1234_v50  ;;  %v1342_v53 = vld [vmem:[#allocation2 + $0x20] ss:$3 sm:$0xff]  ;;  %v1200_v55 = vld [vmem:[#allocation2 + $0x18] ss:$3 sm:$0x1] }
 0x153   : > { %v1236_v56 = vld [vmem:[#allocation2 + $0x19] ss:$3 sm:$0x1]  ;;  %v1396_v57 = vld [vmem:[#allocation2 + $0x21] ss:$3 sm:$0xff] }
 0x154   : > { %v1323_v54 = vmax.f32 %v1269_v52, %v1288_v51  ;;  %v1270_v58 = vmax.f32 %v1200_v55, %v1236_v56  ;;  %v1290_v59 = vld [vmem:[#allocation2 + $0x1a] ss:$3 sm:$0x1]  ;;  %v1344_v61 = vld [vmem:[#allocation2 + $0x38] ss:$3 sm:$0x1] }
 0x155   : > { %v1450_v62 = vld [vmem:[#allocation2 + $0x22] ss:$3 sm:$0xff]  ;;  %v1398_v2 = vld [vmem:[#allocation2 + $0x39] ss:$3 sm:$0x1] }
 0x156   : > { %v1377_v60 = vmax.f32 %v1323_v54, %v1342_v53  ;;  %v1324_v63 = vmax.f32 %v1270_v58, %v1290_v59  ;;  %v1452_v3 = vld [vmem:[#allocation2 + $0x3a] ss:$3 sm:$0x1]  ;;  %v1504_v4 = vld [vmem:[#allocation2 + $0x40] ss:$3 sm:$0xff] }
 0x157   : > { %v1202_v7 = vld [vmem:[#allocation2 + $0x60] ss:$3 sm:$0xff]  ;;  %v1558_v9 = vld [vmem:[#allocation2 + $0x41] ss:$3 sm:$0xff]  ;;  %v1292_v11 = vld [vmem:[#allocation2 + $0x62] ss:$3 sm:$0xff] }
 0x158   : > { %v1431_v1 = vmax.f32 %v1377_v60, %v1396_v57  ;;  %v1378_v6 = vmax.f32 %v1324_v63, %v1344_v61  ;;  %v1238_v10 = vld [vmem:[#allocation2 + $0x61] ss:$3 sm:$0xff]  ;;  %v1612_v12 = vld [vmem:[#allocation2 + $0x42] ss:$3 sm:$0xff]  ;;  %v1346_v18 = vld [vmem:[#allocation2 + $0x80] ss:$3 sm:$0xff] }
 0x159   : > { %v1506_v14 = vld [vmem:[#allocation2 + $0x58] ss:$3 sm:$0x1]  ;;  %v1271_v15 = vmax.f32 %v1202_v7, %v1238_v10  ;;  %v1560_v17 = vld [vmem:[#allocation2 + $0x59] ss:$3 sm:$0x1] }
 0x15a   : > { %v1485_v8 = vmax.f32 %v1431_v1, %v1450_v62  ;;  %v1432_v13 = vmax.f32 %v1378_v6, %v1398_v2  ;;  %v1204_v21 = vld [vmem:[#allocation2 + $0x78] ss:$3 sm:$0x1]  ;;  %v1240_v22 = vld [vmem:[#allocation2 + $0x79] ss:$3 sm:$0x1] }
 0x15b   : > { %v1325_v20 = vmax.f32 %v1271_v15, %v1292_v11  ;;  %v1400_v24 = vld [vmem:[#allocation2 + $0x81] ss:$3 sm:$0xff]  ;;  %v1272_v25 = vmax.f32 %v1204_v21, %v1240_v22  ;;  %v1294_v5 = vld [vmem:[#allocation2 + $0x7a] ss:$3 sm:$0x1] }
 0x15c   : > { %v1539_v16 = vmax.f32 %v1485_v8, %v1504_v4  ;;  %v1486_v19 = vmax.f32 %v1432_v13, %v1452_v3  ;;  %v1614_v27 = vld [vmem:[#allocation2 + $0x5a] ss:$3 sm:$0x1]  ;;  %v1348_v29 = vld [vmem:[#allocation2 + $0x98] ss:$3 sm:$0x1] }
 0x15d   : > { %v1379_v28 = vmax.f32 %v1325_v20, %v1346_v18  ;;  %v1454_v30 = vld [vmem:[#allocation2 + $0x82] ss:$3 sm:$0xff]  ;;  %v1326_v31 = vmax.f32 %v1272_v25, %v1294_v5  ;;  %v1402_v34 = vld [vmem:[#allocation2 + $0x99] ss:$3 sm:$0x1] }
 0x15e   : > { %v1593_v23 = vmax.f32 %v1539_v16, %v1558_v9  ;;  %v1540_v26 = vmax.f32 %v1486_v19, %v1506_v14  ;;  %v1206_v35 = vld [vmem:[#allocation2 + $0xc0] ss:$3 sm:$0xff]  ;;  %v1242_v40 = vld [vmem:[#allocation2 + $0xc1] ss:$3 sm:$0xff]  ;;  %v1296_v41 = vld [vmem:[#allocation2 + $0xc2] ss:$3 sm:$0xff] }
 0x15f   : > { %v1433_v33 = vmax.f32 %v1379_v28, %v1400_v24  ;;  %v1508_v38 = vld [vmem:[#allocation2 + $0xa0] ss:$3 sm:$0xff]  ;;  %v1380_v39 = vmax.f32 %v1326_v31, %v1348_v29  ;;  %v1562_v44 = vld [vmem:[#allocation2 + $0xa1] ss:$3 sm:$0xff]  ;;  %v1273_v46 = vmax.f32 %v1206_v35, %v1242_v40  ;;  %v1616_v48 = vld [vmem:[#allocation2 + $0xa2] ss:$3 sm:$0xff] }
 0x160   : > { %v1647_v0 = vmax.f32 %v1593_v23, %v1612_v12  ;;  %v1594_v32 = vmax.f32 %v1540_v26, %v1560_v17  ;;  %v1456_v45 = vld [vmem:[#allocation2 + $0x9a] ss:$3 sm:$0x1]  ;;  %v1510_v50 = vld [vmem:[#allocation2 + $0xb8] ss:$3 sm:$0x1] }
 0x161   : > { %v1487_v43 = vmax.f32 %v1433_v33, %v1454_v30  ;;  %v1434_v49 = vmax.f32 %v1380_v39, %v1402_v34  ;;  %v1350_v51 = vld [vmem:[#allocation2 + $0xe0] ss:$3 sm:$0xff]  ;;  %v1327_v54 = vmax.f32 %v1273_v46, %v1296_v41  ;;  %v1208_v55 = vld [vmem:[#allocation2 + $0xd8] ss:$3 sm:$0x1] }
 0x162   : > { %v2903_v36 = vpack.c.bf16 %v1647_v0, %v1647_v0  ;;  %v1648_v42 = vmax.f32 %v1594_v32, %v1614_v27  ;;  %v1244_v56 = vld [vmem:[#allocation2 + $0xd9] ss:$3 sm:$0x1]  ;;  %v1404_v58 = vld [vmem:[#allocation2 + $0xe1] ss:$3 sm:$0xff] }
 0x163   : > { %v1541_v53 = vmax.f32 %v1487_v43, %v1508_v38  ;;  %v1488_v57 = vmax.f32 %v1434_v49, %v1456_v45  ;;  %v1274_v59 = vmax.f32 %v1208_v55, %v1244_v56  ;;  %v1298_v60 = vld [vmem:[#allocation2 + $0xda] ss:$3 sm:$0x1]  ;;  %v1564_v63 = vld [vmem:[#allocation2 + $0xb9] ss:$3 sm:$0x1]  ;;  %v1381_v1 = vmax.f32 %v1327_v54, %v1350_v51 }
 0x164   : > { %1737 = vst.msk [vmem:[#allocation3] sm:$0xf] %vm336_vm1, %v2903_v36  ;;  %v2904_v52 = vpack.c.bf16 %v1648_v42, %v1648_v42  ;;  %v1352_v2 = vld [vmem:[#allocation2 + $0xf8] ss:$3 sm:$0x1] }
 0x165   : > { %v1595_v62 = vmax.f32 %v1541_v53, %v1562_v44  ;;  %v1542_v3 = vmax.f32 %v1488_v57, %v1510_v50  ;;  %v1618_v4 = vld [vmem:[#allocation2 + $0xba] ss:$3 sm:$0x1]  ;;  %v1458_v6 = vld [vmem:[#allocation2 + $0xe2] ss:$3 sm:$0xff]  ;;  %v1328_v7 = vmax.f32 %v1274_v59, %v1298_v60  ;;  %v1435_v9 = vmax.f32 %v1381_v1, %v1404_v58 }
 0x166   : > { %v1742_v61 = vsel %vm3748_vm11, %v2904_v52, %v1741_v37  ;;  %v1406_v10 = vld [vmem:[#allocation2 + $0xf9] ss:$3 sm:$0x1]  ;;  %v1210_v11 = vld [vmem:[#allocation2 + $0x120] ss:$3 sm:$0xff] }
 0x167   : > { %1743 = vst [vmem:[#allocation3 + $0x4] sm:$0x1] %v1742_v61  ;;  %v1649_v8 = vmax.f32 %v1595_v62, %v1616_v48  ;;  %v1596_v12 = vmax.f32 %v1542_v3, %v1564_v63  ;;  %v1512_v13 = vld [vmem:[#allocation2 + $0x100] ss:$3 sm:$0xff]  ;;  %v1382_v14 = vmax.f32 %v1328_v7, %v1352_v2  ;;  %v1246_v15 = vld [vmem:[#allocation2 + $0x121] ss:$3 sm:$0xff]  ;;  %v1489_v19 = vmax.f32 %v1435_v9, %v1458_v6 }
 0x168   : > { %v1300_v16 = vld [vmem:[#allocation2 + $0x122] ss:$3 sm:$0xff]  ;;  %v1745_v18 = vld [vmem:[#allocation3 + $0xc] sm:$0x1]  ;;  %v1566_v20 = vld [vmem:[#allocation2 + $0x101] ss:$3 sm:$0xff]  ;;  %v1275_v22 = vmax.f32 %v1210_v11, %v1246_v15 }
 0x169   : > { %v2905_v17 = vpack.c.bf16 %v1649_v8, %v1649_v8  ;;  %v1460_v21 = vld [vmem:[#allocation2 + $0xfa] ss:$3 sm:$0x1]  ;;  %v1650_v23 = vmax.f32 %v1596_v12, %v1618_v4  ;;  %v1620_v24 = vld [vmem:[#allocation2 + $0x102] ss:$3 sm:$0xff]  ;;  %v1436_v25 = vmax.f32 %v1382_v14, %v1406_v10  ;;  %v1543_v27 = vmax.f32 %v1489_v19, %v1512_v13 }
 0x16a   : > { %v1514_v5 = vld [vmem:[#allocation2 + $0x118] ss:$3 sm:$0x1]  ;;  %v1354_v26 = vld [vmem:[#allocation2 + $0x140] ss:$3 sm:$0xff]  ;;  %v1329_v28 = vmax.f32 %v1275_v22, %v1300_v16 }
 0x16b   : > { %1744 = vst.msk [vmem:[#allocation3 + $0x8] sm:$0xf] %vm336_vm1, %v2905_v17  ;;  %v1212_v29 = vld [vmem:[#allocation2 + $0x138] ss:$3 sm:$0x1]  ;;  %v2906_v30 = vpack.c.bf16 %v1650_v23, %v1650_v23  ;;  %v1490_v31 = vmax.f32 %v1436_v25, %v1460_v21  ;;  %v1597_v35 = vmax.f32 %v1543_v27, %v1566_v20 }
 0x16c   : > { %v1248_v0 = vld [vmem:[#allocation2 + $0x139] ss:$3 sm:$0x1]  ;;  %v1408_v32 = vld [vmem:[#allocation2 + $0x141] ss:$3 sm:$0xff]  ;;  %v1383_v37 = vmax.f32 %v1329_v28, %v1354_v26 }
 0x16d   : > { %v1276_v33 = vmax.f32 %v1212_v29, %v1248_v0  ;;  %v1302_v34 = vld [vmem:[#allocation2 + $0x13a] ss:$3 sm:$0x1]  ;;  %v1568_v36 = vld [vmem:[#allocation2 + $0x119] ss:$3 sm:$0x1]  ;;  %v1746_v39 = vsel %vm3748_vm11, %v2906_v30, %v1745_v18  ;;  %v1544_v40 = vmax.f32 %v1490_v31, %v1514_v5  ;;  %v1651_v44 = vmax.f32 %v1597_v35, %v1620_v24 }
 0x16e   : > { %v1356_v38 = vld [vmem:[#allocation2 + $0x158] ss:$3 sm:$0x1]  ;;  %v1622_v41 = vld [vmem:[#allocation2 + $0x11a] ss:$3 sm:$0x1]  ;;  %v1437_v45 = vmax.f32 %v1383_v37, %v1408_v32 }
 0x16f   : > { %v1462_v42 = vld [vmem:[#allocation2 + $0x142] ss:$3 sm:$0xff]  ;;  %v1330_v43 = vmax.f32 %v1276_v33, %v1302_v34  ;;  %1747 = vst [vmem:[#allocation3 + $0xc] sm:$0x1] %v1746_v39  ;;  %v1214_v48 = vld [vmem:[#allocation2 + $0x180] ss:$3 sm:$0xff]  ;;  %v1598_v49 = vmax.f32 %v1544_v40, %v1568_v36  ;;  %v2907_v54 = vpack.c.bf16 %v1651_v44, %v1651_v44 }
 0x170   : > { %v1410_v46 = vld [vmem:[#allocation2 + $0x159] ss:$3 sm:$0x1]  ;;  %v1516_v50 = vld [vmem:[#allocation2 + $0x160] ss:$3 sm:$0xff]  ;;  %v1491_v56 = vmax.f32 %v1437_v45, %v1462_v42 }
 0x171   : > { %v1384_v51 = vmax.f32 %v1330_v43, %v1356_v38  ;;  %v1250_v52 = vld [vmem:[#allocation2 + $0x181] ss:$3 sm:$0xff]  ;;  %v1304_v53 = vld [vmem:[#allocation2 + $0x182] ss:$3 sm:$0xff]  ;;  %v1652_v60 = vmax.f32 %v1598_v49, %v1622_v41  ;;  %v1358_v1 = vld [vmem:[#allocation2 + $0x1a0] ss:$3 sm:$0xff] }
 0x172   : > { %v1749_v55 = vld [vmem:[#allocation3 + $0x14] sm:$0x1]  ;;  %v1570_v57 = vld [vmem:[#allocation2 + $0x161] ss:$3 sm:$0xff]  ;;  %v1277_v59 = vmax.f32 %v1214_v48, %v1250_v52  ;;  %1748 = vst.msk [vmem:[#allocation3 + $0x10] sm:$0xf] %vm336_vm1, %v2907_v54  ;;  %v1545_v2 = vmax.f32 %v1491_v56, %v1516_v50 }
 0x173   : > { %v1464_v58 = vld [vmem:[#allocation2 + $0x15a] ss:$3 sm:$0x1]  ;;  %v1624_v61 = vld [vmem:[#allocation2 + $0x162] ss:$3 sm:$0xff]  ;;  %v1438_v62 = vmax.f32 %v1384_v51, %v1410_v46  ;;  %v2908_v7 = vpack.c.bf16 %v1652_v60, %v1652_v60 }
 0x174   : > { %v1518_v63 = vld [vmem:[#allocation2 + $0x178] ss:$3 sm:$0x1]  ;;  %v1331_v3 = vmax.f32 %v1277_v59, %v1304_v53  ;;  %v1252_v6 = vld [vmem:[#allocation2 + $0x199] ss:$3 sm:$0x1]  ;;  %v1599_v12 = vmax.f32 %v1545_v2, %v1570_v57 }
 0x175   : > { %v1216_v4 = vld [vmem:[#allocation2 + $0x198] ss:$3 sm:$0x1]  ;;  %v1492_v8 = vmax.f32 %v1438_v62, %v1464_v58  ;;  %v1412_v9 = vld [vmem:[#allocation2 + $0x1a1] ss:$3 sm:$0xff]  ;;  %v1750_v16 = vsel %vm3748_vm11, %v2908_v7, %v1749_v55 }
 0x176   : > { %v1278_v10 = vmax.f32 %v1216_v4, %v1252_v6  ;;  %v1306_v11 = vld [vmem:[#allocation2 + $0x19a] ss:$3 sm:$0x1]  ;;  %v1572_v13 = vld [vmem:[#allocation2 + $0x179] ss:$3 sm:$0x1]  ;;  %v1385_v14 = vmax.f32 %v1331_v3, %v1358_v1  ;;  %v1653_v21 = vmax.f32 %v1599_v12, %v1624_v61 }
 0x177   : > { %v1360_v15 = vld [vmem:[#allocation2 + $0x1b8] ss:$3 sm:$0x1]  ;;  %v1546_v17 = vmax.f32 %v1492_v8, %v1518_v63  ;;  %v1626_v18 = vld [vmem:[#allocation2 + $0x17a] ss:$3 sm:$0x1] }
 0x178   : > { %v1466_v19 = vld [vmem:[#allocation2 + $0x1a2] ss:$3 sm:$0xff]  ;;  %v1332_v20 = vmax.f32 %v1278_v10, %v1306_v11  ;;  %1751 = vst [vmem:[#allocation3 + $0x14] sm:$0x1] %v1750_v16  ;;  %v1439_v22 = vmax.f32 %v1385_v14, %v1412_v9  ;;  %v1218_v24 = vld [vmem:[#allocation2 + $0x1e0] ss:$3 sm:$0xff]  ;;  %v2909_v29 = vpack.c.bf16 %v1653_v21, %v1653_v21 }
 0x179   : > { %v1414_v23 = vld [vmem:[#allocation2 + $0x1b9] ss:$3 sm:$0x1]  ;;  %v1600_v25 = vmax.f32 %v1546_v17, %v1572_v13  ;;  %v1520_v5 = vld [vmem:[#allocation2 + $0x1c0] ss:$3 sm:$0xff] }
 0x17a   : > { %v1386_v26 = vmax.f32 %v1332_v20, %v1360_v15  ;;  %v1254_v27 = vld [vmem:[#allocation2 + $0x1e1] ss:$3 sm:$0xff]  ;;  %v1308_v28 = vld [vmem:[#allocation2 + $0x1e2] ss:$3 sm:$0xff]  ;;  %v1753_v0 = vld [vmem:[#allocation3 + $0x1c] sm:$0x1]  ;;  %v1493_v30 = vmax.f32 %v1439_v22, %v1466_v19 }
 0x17b   : > { %v1574_v31 = vld [vmem:[#allocation2 + $0x1c1] ss:$3 sm:$0xff]  ;;  %v1468_v32 = vld [vmem:[#allocation2 + $0x1ba] ss:$3 sm:$0x1]  ;;  %v1279_v33 = vmax.f32 %v1218_v24, %v1254_v27  ;;  %v1654_v34 = vmax.f32 %v1600_v25, %v1626_v18 }
 0x17c   : > { %v1628_v35 = vld [vmem:[#allocation2 + $0x1c2] ss:$3 sm:$0xff]  ;;  %v1440_v36 = vmax.f32 %v1386_v26, %v1414_v23  ;;  %v1522_v37 = vld [vmem:[#allocation2 + $0x1d8] ss:$3 sm:$0x1]  ;;  %v1547_v39 = vmax.f32 %v1493_v30, %v1520_v5 }
 0x17d   : > { %v1362_v38 = vld [vmem:[#allocation2 + $0x200] ss:$3 sm:$0xff]  ;;  %1752 = vst.msk [vmem:[#allocation3 + $0x18] sm:$0xf] %vm336_vm1, %v2909_v29  ;;  %v1333_v40 = vmax.f32 %v1279_v33, %v1308_v28  ;;  %v2910_v43 = vpack.c.bf16 %v1654_v34, %v1654_v34  ;;  %v1416_v45 = vld [vmem:[#allocation2 + $0x201] ss:$3 sm:$0xff] }
 0x17e   : > { %v1220_v41 = vld [vmem:[#allocation2 + $0x1f8] ss:$3 sm:$0x1]  ;;  %v1256_v42 = vld [vmem:[#allocation2 + $0x1f9] ss:$3 sm:$0x1]  ;;  %v1494_v44 = vmax.f32 %v1440_v36, %v1468_v32  ;;  %v1601_v49 = vmax.f32 %v1547_v39, %v1574_v31 }
 0x17f   : > { %v1280_v46 = vmax.f32 %v1220_v41, %v1256_v42  ;;  %v1310_v48 = vld [vmem:[#allocation2 + $0x1fa] ss:$3 sm:$0x1]  ;;  %v1576_v50 = vld [vmem:[#allocation2 + $0x1d9] ss:$3 sm:$0x1]  ;;  %v1387_v51 = vmax.f32 %v1333_v40, %v1362_v38  ;;  %v1754_v53 = vsel %vm3748_vm11, %v2910_v43, %v1753_v0 }
 0x180   : > { %v1364_v52 = vld [vmem:[#allocation2 + $0x218] ss:$3 sm:$0x1]  ;;  %v1548_v54 = vmax.f32 %v1494_v44, %v1522_v37  ;;  %v1630_v55 = vld [vmem:[#allocation2 + $0x1da] ss:$3 sm:$0x1]  ;;  %v1655_v58 = vmax.f32 %v1601_v49, %v1628_v35 }
 0x181   : > { %v1470_v56 = vld [vmem:[#allocation2 + $0x202] ss:$3 sm:$0xff]  ;;  %v1334_v57 = vmax.f32 %v1280_v46, %v1310_v48  ;;  %1755 = vst [vmem:[#allocation3 + $0x1c] sm:$0x1] %v1754_v53  ;;  %v1441_v59 = vmax.f32 %v1387_v51, %v1416_v45  ;;  %v1222_v61 = vld [vmem:[#allocation2 + $0x240] ss:$3 sm:$0xff] }
 0x182   : > { %v1418_v60 = vld [vmem:[#allocation2 + $0x219] ss:$3 sm:$0x1]  ;;  %v1602_v62 = vmax.f32 %v1548_v54, %v1576_v50  ;;  %v1524_v63 = vld [vmem:[#allocation2 + $0x220] ss:$3 sm:$0xff]  ;;  %v2911_v4 = vpack.c.bf16 %v1655_v58, %v1655_v58 }
 0x183   : > { %v1388_v1 = vmax.f32 %v1334_v57, %v1364_v52  ;;  %v1258_v2 = vld [vmem:[#allocation2 + $0x241] ss:$3 sm:$0xff]  ;;  %v1312_v3 = vld [vmem:[#allocation2 + $0x242] ss:$3 sm:$0xff]  ;;  %v1495_v7 = vmax.f32 %v1441_v59, %v1470_v56  ;;  %v1366_v15 = vld [vmem:[#allocation2 + $0x260] ss:$3 sm:$0xff] }
 0x184   : > { %v1757_v6 = vld [vmem:[#allocation3 + $0x24] sm:$0x1]  ;;  %v1472_v9 = vld [vmem:[#allocation2 + $0x21a] ss:$3 sm:$0x1]  ;;  %v1281_v10 = vmax.f32 %v1222_v61, %v1258_v2  ;;  %v1656_v11 = vmax.f32 %v1602_v62, %v1630_v55 }
 0x185   : > { %v1578_v8 = vld [vmem:[#allocation2 + $0x221] ss:$3 sm:$0xff]  ;;  %v1632_v12 = vld [vmem:[#allocation2 + $0x222] ss:$3 sm:$0xff]  ;;  %v1442_v13 = vmax.f32 %v1388_v1, %v1418_v60  ;;  %1756 = vst.msk [vmem:[#allocation3 + $0x20] sm:$0xf] %vm336_vm1, %v2911_v4  ;;  %v1549_v16 = vmax.f32 %v1495_v7, %v1524_v63 }
 0x186   : > { %v1526_v14 = vld [vmem:[#allocation2 + $0x238] ss:$3 sm:$0x1]  ;;  %v1335_v17 = vmax.f32 %v1281_v10, %v1312_v3  ;;  %v1260_v19 = vld [vmem:[#allocation2 + $0x259] ss:$3 sm:$0x1]  ;;  %v2912_v20 = vpack.c.bf16 %v1656_v11, %v1656_v11 }
 0x187   : > { %v1224_v18 = vld [vmem:[#allocation2 + $0x258] ss:$3 sm:$0x1]  ;;  %v1496_v21 = vmax.f32 %v1442_v13, %v1472_v9  ;;  %v1420_v22 = vld [vmem:[#allocation2 + $0x261] ss:$3 sm:$0xff]  ;;  %v1603_v25 = vmax.f32 %v1549_v16, %v1578_v8 }
 0x188   : > { %v1282_v23 = vmax.f32 %v1224_v18, %v1260_v19  ;;  %v1314_v24 = vld [vmem:[#allocation2 + $0x25a] ss:$3 sm:$0x1]  ;;  %v1580_v5 = vld [vmem:[#allocation2 + $0x239] ss:$3 sm:$0x1]  ;;  %v1389_v26 = vmax.f32 %v1335_v17, %v1366_v15  ;;  %v1758_v28 = vsel %vm3748_vm11, %v2912_v20, %v1757_v6 }
 0x189   : > { %v1368_v27 = vld [vmem:[#allocation2 + $0x278] ss:$3 sm:$0x1]  ;;  %v1550_v29 = vmax.f32 %v1496_v21, %v1526_v14  ;;  %v1634_v0 = vld [vmem:[#allocation2 + $0x23a] ss:$3 sm:$0x1]  ;;  %v1657_v32 = vmax.f32 %v1603_v25, %v1632_v12 }
 0x18a   : > { %v1474_v30 = vld [vmem:[#allocation2 + $0x262] ss:$3 sm:$0xff]  ;;  %v1336_v31 = vmax.f32 %v1282_v23, %v1314_v24  ;;  %1759 = vst [vmem:[#allocation3 + $0x24] sm:$0x1] %v1758_v28  ;;  %v1443_v33 = vmax.f32 %v1389_v26, %v1420_v22  ;;  %v1226_v35 = vld [vmem:[#allocation2 + $0x2a0] ss:$3 sm:$0xff] }
 0x18b   : > { %v1422_v34 = vld [vmem:[#allocation2 + $0x279] ss:$3 sm:$0x1]  ;;  %v1604_v36 = vmax.f32 %v1550_v29, %v1580_v5  ;;  %v1528_v37 = vld [vmem:[#allocation2 + $0x280] ss:$3 sm:$0xff]  ;;  %v2913_v41 = vpack.c.bf16 %v1657_v32, %v1657_v32 }
 0x18c   : > { %v1390_v38 = vmax.f32 %v1336_v31, %v1368_v27  ;;  %v1262_v39 = vld [vmem:[#allocation2 + $0x2a1] ss:$3 sm:$0xff]  ;;  %v1316_v40 = vld [vmem:[#allocation2 + $0x2a2] ss:$3 sm:$0xff]  ;;  %v1761_v42 = vld [vmem:[#allocation3 + $0x2c] sm:$0x1]  ;;  %v1497_v43 = vmax.f32 %v1443_v33, %v1474_v30 }
 0x18d   : > { %v1582_v44 = vld [vmem:[#allocation2 + $0x281] ss:$3 sm:$0xff]  ;;  %v1476_v45 = vld [vmem:[#allocation2 + $0x27a] ss:$3 sm:$0x1]  ;;  %v1283_v46 = vmax.f32 %v1226_v35, %v1262_v39  ;;  %v1658_v48 = vmax.f32 %v1604_v36, %v1634_v0 }
 0x18e   : > { %v1636_v49 = vld [vmem:[#allocation2 + $0x282] ss:$3 sm:$0xff]  ;;  %v1444_v50 = vmax.f32 %v1390_v38, %v1422_v34  ;;  %v1530_v51 = vld [vmem:[#allocation2 + $0x298] ss:$3 sm:$0x1]  ;;  %v1551_v53 = vmax.f32 %v1497_v43, %v1528_v37 }
 0x18f   : > { %v1370_v52 = vld [vmem:[#allocation2 + $0x2c0] ss:$3 sm:$0xff]  ;;  %1760 = vst.msk [vmem:[#allocation3 + $0x28] sm:$0xf] %vm336_vm1, %v2913_v41  ;;  %v1337_v54 = vmax.f32 %v1283_v46, %v1316_v40  ;;  %v2914_v57 = vpack.c.bf16 %v1658_v48, %v1658_v48  ;;  %v1424_v59 = vld [vmem:[#allocation2 + $0x2c1] ss:$3 sm:$0xff] }
 0x190   : > { %v1228_v55 = vld [vmem:[#allocation2 + $0x2b8] ss:$3 sm:$0x1]  ;;  %v1264_v56 = vld [vmem:[#allocation2 + $0x2b9] ss:$3 sm:$0x1]  ;;  %v1498_v58 = vmax.f32 %v1444_v50, %v1476_v45  ;;  %v1605_v62 = vmax.f32 %v1551_v53, %v1582_v44 }
 0x191   : > { %v1284_v60 = vmax.f32 %v1228_v55, %v1264_v56  ;;  %v1318_v61 = vld [vmem:[#allocation2 + $0x2ba] ss:$3 sm:$0x1]  ;;  %v1584_v63 = vld [vmem:[#allocation2 + $0x299] ss:$3 sm:$0x1]  ;;  %v1391_v1 = vmax.f32 %v1337_v54, %v1370_v52  ;;  %v1762_v3 = vsel %vm3748_vm11, %v2914_v57, %v1761_v42 }
 0x192   : > { %v1372_v2 = vld [vmem:[#allocation2 + $0x2d8] ss:$3 sm:$0x1]  ;;  %v1552_v4 = vmax.f32 %v1498_v58, %v1530_v51  ;;  %v1638_v6 = vld [vmem:[#allocation2 + $0x29a] ss:$3 sm:$0x1]  ;;  %v1659_v9 = vmax.f32 %v1605_v62, %v1636_v49 }
 0x193   : > { %v1478_v7 = vld [vmem:[#allocation2 + $0x2c2] ss:$3 sm:$0xff]  ;;  %v1338_v8 = vmax.f32 %v1284_v60, %v1318_v61  ;;  %1763 = vst [vmem:[#allocation3 + $0x2c] sm:$0x1] %v1762_v3  ;;  %v1445_v10 = vmax.f32 %v1391_v1, %v1424_v59  ;;  %v1230_v12 = vld [vmem:[#allocation2 + $0x300] ss:$3 sm:$0xff] }
 0x194   : > { %v1426_v11 = vld [vmem:[#allocation2 + $0x2d9] ss:$3 sm:$0x1]  ;;  %v1606_v13 = vmax.f32 %v1552_v4, %v1584_v63  ;;  %v1532_v14 = vld [vmem:[#allocation2 + $0x2e0] ss:$3 sm:$0xff]  ;;  %v2915_v18 = vpack.c.bf16 %v1659_v9, %v1659_v9 }
 0x195   : > { %v1392_v15 = vmax.f32 %v1338_v8, %v1372_v2  ;;  %v1266_v16 = vld [vmem:[#allocation2 + $0x301] ss:$3 sm:$0xff]  ;;  %v1320_v17 = vld [vmem:[#allocation2 + $0x302] ss:$3 sm:$0xff]  ;;  %v1499_v20 = vmax.f32 %v1445_v10, %v1478_v7  ;;  %v1374_v27 = vld [vmem:[#allocation2 + $0x320] ss:$3 sm:$0xff] }
 0x196   : > { %v1765_v19 = vld [vmem:[#allocation3 + $0x34] sm:$0x1]  ;;  %v1586_v21 = vld [vmem:[#allocation2 + $0x2e1] ss:$3 sm:$0xff]  ;;  %v1285_v23 = vmax.f32 %v1230_v12, %v1266_v16  ;;  %v1660_v24 = vmax.f32 %v1606_v13, %v1638_v6  ;;  %1764 = vst.msk [vmem:[#allocation3 + $0x30] sm:$0xf] %vm336_vm1, %v2915_v18 }
 0x197   : > { %v1480_v22 = vld [vmem:[#allocation2 + $0x2da] ss:$3 sm:$0x1]  ;;  %v1640_v25 = vld [vmem:[#allocation2 + $0x2e2] ss:$3 sm:$0xff]  ;;  %v1446_v5 = vmax.f32 %v1392_v15, %v1426_v11  ;;  %v1553_v28 = vmax.f32 %v1499_v20, %v1532_v14 }
 0x198   : > { %v1534_v26 = vld [vmem:[#allocation2 + $0x2f8] ss:$3 sm:$0x1]  ;;  %v1339_v29 = vmax.f32 %v1285_v23, %v1320_v17  ;;  %v1268_v30 = vld [vmem:[#allocation2 + $0x319] ss:$3 sm:$0x1]  ;;  %v2916_v31 = vpack.c.bf16 %v1660_v24, %v1660_v24 }
 0x199   : > { %v1232_v0 = vld [vmem:[#allocation2 + $0x318] ss:$3 sm:$0x1]  ;;  %v1500_v32 = vmax.f32 %v1446_v5, %v1480_v22  ;;  %v1428_v33 = vld [vmem:[#allocation2 + $0x321] ss:$3 sm:$0xff]  ;;  %v1607_v36 = vmax.f32 %v1553_v28, %v1586_v21 }
 0x19a   : > { %v1286_v34 = vmax.f32 %v1232_v0, %v1268_v30  ;;  %v1322_v35 = vld [vmem:[#allocation2 + $0x31a] ss:$3 sm:$0x1]  ;;  %v1588_v37 = vld [vmem:[#allocation2 + $0x2f9] ss:$3 sm:$0x1]  ;;  %v1393_v38 = vmax.f32 %v1339_v29, %v1374_v27  ;;  %v1766_v40 = vsel %vm3748_vm11, %v2916_v31, %v1765_v19 }
 0x19b   : > { %v1376_v39 = vld [vmem:[#allocation2 + $0x338] ss:$3 sm:$0x1]  ;;  %v1554_v41 = vmax.f32 %v1500_v32, %v1534_v26  ;;  %v1482_v42 = vld [vmem:[#allocation2 + $0x322] ss:$3 sm:$0xff]  ;;  %v1661_v44 = vmax.f32 %v1607_v36, %v1640_v25 }
 0x19c   : > { %v1340_v43 = vmax.f32 %v1286_v34, %v1322_v35  ;;  %1767 = vst [vmem:[#allocation3 + $0x34] sm:$0x1] %v1766_v40  ;;  %v1642_v45 = vld [vmem:[#allocation2 + $0x2fa] ss:$3 sm:$0x1]  ;;  %v1447_v46 = vmax.f32 %v1393_v38, %v1428_v33 }
 0x19d   : > { %v1430_v48 = vld [vmem:[#allocation2 + $0x339] ss:$3 sm:$0x1]  ;;  %v1608_v49 = vmax.f32 %v1554_v41, %v1588_v37  ;;  %v1536_v50 = vld [vmem:[#allocation2 + $0x340] ss:$3 sm:$0xff]  ;;  %v2917_v52 = vpack.c.bf16 %v1661_v44, %v1661_v44 }
 0x19e   : > { %v1394_v51 = vmax.f32 %v1340_v43, %v1376_v39  ;;  %v1501_v53 = vmax.f32 %v1447_v46, %v1482_v42  ;;  %v1484_v54 = vld [vmem:[#allocation2 + $0x33a] ss:$3 sm:$0x1]  ;;  %v1590_v56 = vld [vmem:[#allocation2 + $0x341] ss:$3 sm:$0xff] }
 0x19f   : > { %v1662_v55 = vmax.f32 %v1608_v49, %v1642_v45  ;;  %1768 = vst.msk [vmem:[#allocation3 + $0x38] sm:$0xf] %vm336_vm1, %v2917_v52  ;;  %v1769_v58 = vld [vmem:[#allocation3 + $0x3c] sm:$0x1]  ;;  %v1644_v62 = vld [vmem:[#allocation2 + $0x342] ss:$3 sm:$0xff] }
 0x1a0   : > { %v1448_v57 = vmax.f32 %v1394_v51, %v1430_v48  ;;  %v1555_v59 = vmax.f32 %v1501_v53, %v1536_v50  ;;  %v1538_v60 = vld [vmem:[#allocation2 + $0x358] ss:$3 sm:$0x1]  ;;  %v1592_v2 = vld [vmem:[#allocation2 + $0x359] ss:$3 sm:$0x1] }
 0x1a1   : > { %v2918_v61 = vpack.c.bf16 %v1662_v55, %v1662_v55  ;;  %v1646_v7 = vld [vmem:[#allocation2 + $0x35a] ss:$3 sm:$0x1]  ;;  %v1773_v11 = vld [vmem:[#allocation3 + $0x44] sm:$0x1] }
 0x1a2   : > { %v1502_v63 = vmax.f32 %v1448_v57, %v1484_v54  ;;  %v1609_v1 = vmax.f32 %v1555_v59, %v1590_v56 }
 0x1a3   : > { %v1770_v3 = vsel %vm3748_vm11, %v2918_v61, %v1769_v58 }
 0x1a4   : > { %v1556_v4 = vmax.f32 %v1502_v63, %v1538_v60  ;;  %1771 = vst [vmem:[#allocation3 + $0x3c] sm:$0x1] %v1770_v3  ;;  %v1663_v6 = vmax.f32 %v1609_v1, %v1644_v62 }
 0x1a6   : > { %v1610_v8 = vmax.f32 %v1556_v4, %v1592_v2  ;;  %v2919_v9 = vpack.c.bf16 %v1663_v6, %v1663_v6 }
 0x1a8   : > { %v1664_v10 = vmax.f32 %v1610_v8, %v1646_v7  ;;  %1772 = vst.msk [vmem:[#allocation3 + $0x40] sm:$0xf] %vm336_vm1, %v2919_v9 }
 0x1aa   : > { %v2920_v12 = vpack.c.bf16 %v1664_v10, %v1664_v10 }
 0x1ac   : > { %v1774_v13 = vsel %vm3748_vm11, %v2920_v12, %v1773_v11 }
 0x1ad   : > { %1775 = vst [vmem:[#allocation3 + $0x44] sm:$0x1] %v1774_v13 }
 0x1ae LB: >> { %v3179_v14 = vld [vmem:[%s3966_s5 + $0x18] sm:$0xff]   ;;  %v3283_v15 = vmov 0.0   ;;  %v3180_v47 = vld [vmem:[%s3966_s5 + $0x8] sm:$0xff]   ;;  %v3181_v16 = vld [vmem:[%s3966_s5 + $0x10] sm:$0xff]   ;;  %vm3284_vm12 = vmmov 0   ;;  %s2921_s24 = sshll.u32 %s3279_s27, 3  ;;  %s3279_s27 = sphi %s3778_s27, %s1801_s27  }
 0x1af   : >> { %3033 = vmatprep.subr.bf16.mxu0 %v3283_v15  ;;  %3041 = vmatprep.subr.bf16.mxu1 %v3283_v15  ;;  %v3182_v17 = vld [vmem:[%s3966_s5] sm:$0xff]   ;;  %s3804_s16 = scalar_lea.vmem [#allocation3], %s2921_s24  ;;  %v3185_v22 = vld [vmem:[%s3966_s5 + $0x38] sm:$0xff]   ;;  %v3184_v24 = vld [vmem:[%s3966_s5 + $0x28] sm:$0xff]   ;;  %s2893_s22 = sshll.u32 %s3279_s27, 4  ;;  %vm2443_vm13 = vcmask 522240  }
 0x1b0   : >> { %3034 = vmatpush3.bf16.msra.mxu0 %v3179_v14  ;;  %3037 = vmatprep.mubr.msk.bf16.mxu0 %vm3284_vm12, %v3283_v15  ;;  %v3187_v26 = vld [vmem:[%s3966_s5 + $0x30] sm:$0xff]   ;;  %v3186_v29 = vld [vmem:[%s3966_s5 + $0x20] sm:$0xff]   ;;  %v3191_v0 = vld [vmem:[%s3966_s5 + $0x58] sm:$0xff]   ;;  %s2681_s25 = scalar_lea.vmem [#allocation4], %s2893_s22  ;;  %s1801_s27 = sadd.s32 1, %s3279_s27  }
 0x1b1   : >> { %3042 = vmatpush3.bf16.msra.mxu1 %v3180_v47  ;;  %3035 = vmatprep.subr.bf16.mxu0 %v3283_v15  ;;  %v3190_v30 = vld [vmem:[%s3966_s5 + $0x48] sm:$0xff]   ;;  %v3193_v35 = vld [vmem:[%s3966_s5 + $0x50] sm:$0xff]   ;;  %v3192_v39 = vld [vmem:[%s3966_s5 + $0x40] sm:$0xff]   ;;  %p1798_p12 = scmp.ge.s32.totalorder %s1801_s27, 7  }
 0x1b2   : >> { %3043 = vmatprep.subr.bf16.mxu1 %v3283_v15  ;;  %3045 = vmatprep.mubr.msk.bf16.mxu1 %vm3284_vm12, %v3283_v15  ;;  %v3196_v42 = vld [vmem:[%s3966_s5 + $0x78] sm:$0xff]   ;;  %v3195_v44 = vld [vmem:[%s3966_s5 + $0x68] sm:$0xff]   ;;  %v3198_v48 = vld [vmem:[%s3966_s5 + $0x70] sm:$0xff]   ;;  %vm2489_vm14 = vcmask (%p1798_p12), 517120   ;;  %vm2497_vm15 = vcmask (%p1798_p12), 519170   ;;  %s2924_s27 = sshll.u32 (%p1798_p12), %s3359_s13, 7 }
 0x1b3   : >> { %v3197_v49 = vld [vmem:[%s3966_s5 + $0x60] sm:$0xff]   ;;  %v3200_v51 = vld [vmem:[%s3966_s5 + $0x88] sm:$0xff]   ;;  %s2522_s26 = sshll.u32 (%p1798_p12), %s3617_s28, 4  ;;  %s3914_s17 = scalar_lea.hbm (%p1798_p12), %s3970_s9, %s2924_s27  ;;  %s3916_s26 = int_to_ptr.vmem [resolvable:$true] %s2522_s26 }
 0x1b4   : >> { %v1805_v18 = vld [vmem:[%s3804_s16] sm:$0xf]  ;;  %3036 = vmatpush3.bf16.msra.mxu0 %v3181_v16  ;;  %v2837_v25 = vld [vmem:[%s3804_s16 + $0x8] sm:$0xf]  ;;  %v2864_v34 = vld [vmem:[%s3804_s16 + $0x10] sm:$0xf] }
 0x1b5   : >> { %v2821_v19 = vcombine.low %v1805_v18, %v1805_v18  ;;  %3044 = vmatpush3.bf16.msra.mxu1 %v3182_v17  ;;  %3049 = vmatprep.subr.bf16.mxu0 %v3283_v15  ;;  %v3188_v27 = vld [vmem:[%s3804_s16] sm:$0x1e]   ;;  %v2849_v28 = vcombine.low %v2837_v25, %v2837_v25  ;;  %v3194_v33 = vld [vmem:[%s3804_s16 + $0x8] sm:$0x1e]   ;;  %v2876_v36 = vcombine.low %v2864_v34, %v2864_v34  ;;  %v3202_v52 = vld [vmem:[%s3804_s16 + $0x10] sm:$0x1e]  }
 0x1b6   : >> { %3057 = vmatprep.subr.bf16.mxu1 %v3283_v15  ;;  %v1947_v31 = vrot.slane %v3188_v27, 1  ;;  %v2153_v40 = vrot.slane %v3194_v33, 1  ;;  %v3201_v53 = vld [vmem:[%s3966_s5 + $0x80] sm:$0xff]   ;;  %v2359_v54 = vrot.slane %v3202_v52, 1  ;;  %s3976_s14 = sand.u32 (%p1798_p12), 1, %s3263_s10   ;;  %s3203_s13 = scalar_lea.vmem (%p1798_p12), %s3916_s26, 128 }
 0x1b7   : >> { %v1819_v20 = vshrl.u32 %v2821_v19, 16  ;;  %v1821_v21 = vshll.u32 %v2821_v19, 16  ;;  %v2081_v32 = vshll.u32 %v2849_v28, 16  ;;  %v2079_v37 = vshrl.u32 %v2849_v28, 16  ;;  %s3921_s21 = scalar_lea.sflag (%p1798_p12), [#allocation6], %s3976_s14  ;;  %p3204_p13 = scmp.ne.s32.totalorder (%p1798_p12), %s3916_s26, %s3203_s13 }
 0x1b8   : >> { %3046 = vmatmul.mubr.msk.bf16.vlgmr.msra.gmra.mxu1 %vm332_vm0, %v1805_v18  ;;  %v2287_v41 = vshll.u32 %v2876_v36, 16  ;;  %v2285_v45 = vshrl.u32 %v2876_v36, 16  ;;  %s3285_s22 = smov (%p1798_p12), [#allocation5]  }
 0x1b9   : >> { %v1823_v23 = vrot.slane %v1821_v21, 1  ;;  %3058 = vmatpush3.bf16.msra.mxu1 %v3185_v22  ;;  %3061 = vmatprep.mubr.msk.bf16.mxu1 %vm3284_vm12, %v3283_v15  ;;  %v2083_v38 = vrot.slane %v2081_v32, 1  ;;  %p3205_p0 = pnand (%p1798_p12), %p3204_p13, %p3376_p5  ;;  %s3207_s23 = sshll.u32 (%p1798_p12), %s3285_s22, 4  ;;  %s3208_s23 = int_to_ptr.vmem [resolvable:$false] %s3207_s23 }
 0x1ba   : >> { %3059 = vmatprep.subr.bf16.mxu1 %v3283_v15  ;;  %v2289_v46 = vrot.slane %v2287_v41, 1  ;;  %s3209_s24 = scalar_lea.vmem (%p1798_p12), %s3208_s23, 256  ;;  %p3210_p2 = scmp.lt.s32.totalorder (%p1798_p12), %s3916_s26, %s3208_s23 }
 0x1bb   : >> { %v1824_v5 = vor.u32 %v1823_v23, %v1819_v20  ;;  %v2084_v43 = vor.u32 %v2083_v38, %v2079_v37  ;;  %v2892_v37 = vld [vmem:[%s3969_s8] ss:$0 sm:$0xff]  ;;  %p3206_p1 = pneg (%p1798_p12), %p3205_p0  ;;  %p3211_p3 = scmp.lt.s32.totalorder (%p1798_p12), %s3209_s24, %s3203_s13 }
 0x1bc   : >> { %v2290_v50 = vor.u32 %v2289_v46, %v2285_v45 }
 0x1bd   : >> { %3038 = vmatmul.mubr.msk.bf16.vlgmr.msra.gmra.mxu0 %vm332_vm0, %v1824_v5  ;;  %3060 = vmatpush3.bf16.msra.mxu1 %v3187_v26  ;;  %p3212_p4 = por (%p1798_p12), %p3211_p3, %p3210_p2 }
 0x1be   : >> { %3050 = vmatpush3.bf16.msra.mxu0 %v3184_v24  ;;  %3053 = vmatprep.mubr.msk.bf16.mxu0 %vm3284_vm12, %v3283_v15 }
 0x1bf   : >> { %3051 = vmatprep.subr.bf16.mxu0 %v3283_v15  ;;  %3073 = vmatprep.subr.bf16.mxu1 %v3283_v15  ;;  %p3213_p7 = pnand (%p1798_p12), %p3212_p4, %p3206_p1 }
 0x1c0   : >> { %3062 = vmatmul.mubr.msk.bf16.vlgmr.msra.gmra.mxu1 %vm332_vm0, %v2837_v25 }
 0x1c1   : >> { %3074 = vmatpush3.bf16.msra.mxu1 %v3191_v0  ;;  %3077 = vmatprep.mubr.msk.bf16.mxu1 %vm3284_vm12, %v3283_v15 }
 0x1c2   : >> { %3052 = vmatpush3.bf16.msra.mxu0 %v3186_v29  ;;  %3075 = vmatprep.subr.bf16.mxu1 %v3283_v15 }
 0x1c3   : >> { %3065 = vmatprep.subr.bf16.mxu0 %v3283_v15 }
 0x1c5   : >> { %3054 = vmatmul.mubr.msk.bf16.vlgmr.msra.gmra.mxu0 %vm332_vm0, %v1947_v31  ;;  %3076 = vmatpush3.bf16.msra.mxu1 %v3193_v35 }
 0x1c6   : >> { %3066 = vmatpush3.bf16.msra.mxu0 %v3190_v30  ;;  %3069 = vmatprep.mubr.msk.bf16.mxu0 %vm3284_vm12, %v3283_v15  ;;  %v2890_v30 = vld [vmem:[%s3967_s6] ss:$0 sm:$0xff] }
 0x1c7   : >> { %3067 = vmatprep.subr.bf16.mxu0 %v3283_v15  ;;  %3089 = vmatprep.subr.bf16.mxu1 %v3283_v15 }
 0x1c8   : >> { %3078 = vmatmul.mubr.msk.bf16.vlgmr.msra.gmra.mxu1 %vm332_vm0, %v2153_v40 }
 0x1c9   : >> { %3090 = vmatpush3.bf16.msra.mxu1 %v3196_v42  ;;  %3093 = vmatprep.mubr.msk.bf16.mxu1 %vm3284_vm12, %v3283_v15 }
 0x1ca   : >> { %3068 = vmatpush3.bf16.msra.mxu0 %v3192_v39  ;;  %3091 = vmatprep.subr.bf16.mxu1 %v3283_v15 }
 0x1cb   : >> { %3081 = vmatprep.subr.bf16.mxu0 %v3283_v15 }
 0x1cd   : >> { %3070 = vmatmul.mubr.msk.bf16.vlgmr.msra.gmra.mxu0 %vm332_vm0, %v2084_v43  ;;  %3092 = vmatpush3.bf16.msra.mxu1 %v3198_v48 }
 0x1ce   : >> { %3082 = vmatpush3.bf16.msra.mxu0 %v3195_v44  ;;  %3085 = vmatprep.mubr.msk.bf16.mxu0 %vm3284_vm12, %v3283_v15 }
 0x1cf   : >> { %3083 = vmatprep.subr.bf16.mxu0 %v3283_v15 }
 0x1d0   : >> { %3094 = vmatmul.mubr.msk.bf16.vlgmr.msra.gmra.mxu1 %vm332_vm0, %v2290_v50 }
 0x1d2   : >> { %3084 = vmatpush3.bf16.msra.mxu0 %v3197_v49 }
 0x1d3   : >> { %3097 = vmatprep.subr.bf16.mxu0 %v3283_v15 }
 0x1d5   : >> { %3086 = vmatmul.mubr.msk.bf16.vlgmr.msra.gmra.mxu0 %vm332_vm0, %v2864_v34  ;;  %v2891_v34 = vld [vmem:[%s3968_s7] ss:$0 sm:$0xff] }
 0x1d6   : >> { %3098 = vmatpush3.bf16.msra.mxu0 %v3200_v51  ;;  %3101 = vmatprep.mubr.msk.bf16.mxu0 %vm3284_vm12, %v3283_v15 }
 0x1d7   : >> { %3099 = vmatprep.subr.bf16.mxu0 %v3283_v15 }
 0x1da   : >> { %3100 = vmatpush3.bf16.msra.mxu0 %v3201_v53 }
 0x1dd   : >> { %3102 = vmatmul.mubr.msk.bf16.vlgmr.msra.gmra.mxu0 %vm332_vm0, %v2359_v54 }
 0x278   : >> { %v1929_v55 = vpop.f32.mrf.mxu1 }
 0x27a   : >> { %v3047_v56 = vpop.f32.mrf.mxu1 }
 0x27c   : >> { %v1932_v58 = vpop.f32.mrf.mxu1 }
 0x27d   : >> { %v1874_v57 = vpop.f32.mrf.mxu0 }
 0x27e   : >> { %v3048_v60 = vpop.f32.mrf.mxu1  ;;  %v1930_v8 = vadd.f32 %v1929_v55, %v1874_v57 }
 0x27f   : >> { %v3039_v59 = vpop.f32.mrf.mxu0 }
 0x280   : >> { %v2063_v62 = vpop.f32.mrf.mxu1 }
 0x281   : >> { %v1877_v61 = vpop.f32.mrf.mxu0 }
 0x282   : >> { %v3063_v1 = vpop.f32.mrf.mxu1 }
 0x283   : >> { %v3040_v63 = vpop.f32.mrf.mxu0 }
 0x284   : >> { %v2066_v3 = vpop.f32.mrf.mxu1 }
 0x285   : >> { %v1997_v2 = vpop.f32.mrf.mxu0 }
 0x286   : >> { %v3064_v6 = vpop.f32.mrf.mxu1  ;;  %v2003_v11 = vadd.f32 %v1997_v2, %v1930_v8 }
 0x287   : >> { %v3055_v4 = vpop.f32.mrf.mxu0 }
 0x288   : >> { %v2203_v9 = vpop.f32.mrf.mxu1  ;;  %v2069_v47 = vadd.f32 %v2063_v62, %v2003_v11 }
 0x289   : >> { %v2000_v7 = vpop.f32.mrf.mxu0 }
 0x28a   : >> { %v3079_v12 = vpop.f32.mrf.mxu1 }
 0x28b   : >> { %v3056_v10 = vpop.f32.mrf.mxu0 }
 0x28c   : >> { %v2206_v14 = vpop.f32.mrf.mxu1 }
 0x28d   : >> { %v2134_v13 = vpop.f32.mrf.mxu0 }
 0x28e   : >> { %v3080_v16 = vpop.f32.mrf.mxu1  ;;  %v2140_v18 = vadd.f32 %v2134_v13, %v2069_v47 }
 0x28f   : >> { %v3071_v15 = vpop.f32.mrf.mxu0 }
 0x290   : >> { %v2340_v19 = vpop.f32.mrf.mxu1  ;;  %v2209_v23 = vadd.f32 %v2203_v9, %v2140_v18 }
 0x291   : >> { %v2137_v17 = vpop.f32.mrf.mxu0 }
 0x292   : >> { %v3095_v21 = vpop.f32.mrf.mxu1 }
 0x293   : >> { %v3072_v20 = vpop.f32.mrf.mxu0 }
 0x294   : >> { %v2343_v24 = vpop.f32.mrf.mxu1 }
 0x295   : >> { %v2269_v22 = vpop.f32.mrf.mxu0 }
 0x296   : >> { %v2275_v5 = vadd.f32 %v2269_v22, %v2209_v23  ;;  %v3096_v26 = vpop.f32.mrf.mxu1 }
 0x297   : >> { %v3087_v25 = vpop.f32.mrf.mxu0 }
 0x298   : >> { %v2346_v29 = vadd.f32 %v2340_v19, %v2275_v5 }
 0x299   : >> { %v2272_v27 = vpop.f32.mrf.mxu0 }
 0x29b   : >> { %v3088_v28 = vpop.f32.mrf.mxu0 }
 0x29d   : >> { %v2409_v0 = vpop.f32.mrf.mxu0 }
 0x29e   : >> { %v2415_v31 = vadd.f32 %v2409_v0, %v2346_v29 }
 0x29f   : >> { %v3103_v32 = vpop.f32.mrf.mxu0 }
 0x2a0   : >> { %v2423_v33 = vadd.f32 %v2890_v30, %v2415_v31 }
 0x2a1   : >> { %v2412_v35 = vpop.f32.mrf.mxu0 }
 0x2a2   : >> { %v2424_v36 = vmax.f32 %v2423_v33, 0.0 }
 0x2a3   : >> { %v3104_v38 = vpop.f32.mrf.mxu0 }
 0x2a4   : >> { %v2432_v39 = vmul.f32 %v2891_v34, %v2424_v36  ;;  %1800 = sbr.rel (!%p1798_p12) target bundleno = 430 (0x1ae), region = 316 }
 0x2a6   : >> { %v2440_v40 = vadd.f32 %v2892_v37, %v2432_v39 }
 0x2a8   : >> { %2894 = vst.msk [vmem:[%s2681_s25 + $0x11] sm:$0x7f] %vm2443_vm13, %v2440_v40 }
 0x2af   : > { %v2445_v41 = vld [vmem:[#allocation4] ss:$2 sm:$0xf]  ;;  %v2453_v42 = vld [vmem:[#allocation4 + $0x1] ss:$2 sm:$0xf] }
 0x2b0   : > { %v2460_v43 = vmax.f32 %v2445_v41, %v2453_v42  ;;  %v2465_v44 = vld [vmem:[#allocation4 + $0x10] ss:$2 sm:$0xf]  ;;  %v2477_v45 = vld [vmem:[#allocation4 + $0x11] ss:$2 sm:$0xf] }
 0x2b1   : > { %v2447_v46 = vld [vmem:[#allocation4 + $0x20] ss:$2 sm:$0xf]  ;;  %v2455_v49 = vld [vmem:[#allocation4 + $0x21] ss:$2 sm:$0xf] }
 0x2b2   : > { %v2472_v48 = vmax.f32 %v2460_v43, %v2465_v44  ;;  %v2467_v50 = vld [vmem:[#allocation4 + $0x30] ss:$2 sm:$0xf]  ;;  %v2461_v51 = vmax.f32 %v2447_v46, %v2455_v49  ;;  %v2479_v52 = vld [vmem:[#allocation4 + $0x31] ss:$2 sm:$0xf] }
 0x2b3   : > { %v2449_v53 = vld [vmem:[#allocation4 + $0x40] ss:$2 sm:$0xf]  ;;  %v2457_v55 = vld [vmem:[#allocation4 + $0x41] ss:$2 sm:$0xf] }
 0x2b4   : > { %v2484_v54 = vmax.f32 %v2472_v48, %v2477_v45  ;;  %v2469_v56 = vld [vmem:[#allocation4 + $0x50] ss:$2 sm:$0xf]  ;;  %v2473_v57 = vmax.f32 %v2461_v51, %v2467_v50  ;;  %v2462_v58 = vmax.f32 %v2449_v53, %v2457_v55  ;;  %v2481_v59 = vld [vmem:[#allocation4 + $0x51] ss:$2 sm:$0xf] }
 0x2b5   : > { %v2451_v60 = vld [vmem:[#allocation4 + $0x60] ss:$2 sm:$0xf]  ;;  %v2459_v62 = vld [vmem:[#allocation4 + $0x61] ss:$2 sm:$0xf] }
 0x2b6   : > { %v2488_v61 = vpack.c.bf16 %v2484_v54, %v2484_v54  ;;  %v2471_v63 = vld [vmem:[#allocation4 + $0x70] ss:$2 sm:$0xf]  ;;  %v2485_v1 = vmax.f32 %v2473_v57, %v2479_v52  ;;  %v2474_v2 = vmax.f32 %v2462_v58, %v2469_v56  ;;  %v2463_v3 = vmax.f32 %v2451_v60, %v2459_v62  ;;  %v2483_v4 = vld [vmem:[#allocation4 + $0x71] ss:$2 sm:$0xf] }
 0x2b8   : > { %2490 = vst.msk [vmem:[%s3617_s28] sm:$0x3] %vm2489_vm14, %v2488_v61  ;;  %v2922_v6 = vpack.c.bf16 %v2485_v1, %v2485_v1  ;;  %v2486_v7 = vmax.f32 %v2474_v2, %v2481_v59  ;;  %v2475_v8 = vmax.f32 %v2463_v3, %v2471_v63 }
 0x2ba   : > { %v2495_v9 = vrot.slane %v2922_v6, 6  ;;  %v2499_v10 = vpack.c.bf16 %v2486_v7, %v2486_v7  ;;  %v2487_v11 = vmax.f32 %v2475_v8, %v2483_v4 }
 0x2bc   : > { %2498 = vst.msk [vmem:[%s3617_s28] sm:$0xc] %vm2497_vm15, %v2495_v9  ;;  %v2923_v12 = vpack.c.bf16 %v2487_v11, %v2487_v11 }
 0x2bd   : > { %2500 = vst.msk [vmem:[%s3617_s28 + $0x4] sm:$0x3] %vm2489_vm14, %v2499_v10 }
 0x2be   : > { %v2505_v13 = vrot.slane %v2923_v12, 6 }
 0x2c0   : > { %2507 = vst.msk [vmem:[%s3617_s28 + $0x4] sm:$0xc] %vm2497_vm15, %v2505_v13 }
 0x2c1   : > { %3216 = shalt.err (!%p3213_p7)
}
 0x2c2   : > { %s3217_s28 = scalar_lea.hbm %s3914_s17, 128  ;;  %s3221_s29 = scalar_lea.hbm %s3970_s9, 256 }
 0x2c3   : > { %p3218_p8 = scmp.ne.s32.totalorder %s3914_s17, %s3217_s28  ;;  %p3222_p11 = scmp.lt.s32.totalorder %s3914_s17, %s3970_s9 }
 0x2c4   : > { %p3223_p12 = scmp.lt.s32.totalorder %s3221_s29, %s3217_s28 }
 0x2c5   : > { %p3219_p9 = pnand %p3218_p8, %p3376_p5 }
 0x2c6   : > { %p3224_p13 = por %p3223_p12, %p3222_p11 }
 0x2c7   : > { %p3220_p10 = pneg %p3219_p9 }
 0x2c9   : > { %p3225_p0 = pnand %p3224_p13, %p3220_p10 }
 0x2cb   : > { %3228 = shalt.err (!%p3225_p0)
}
 0x2cc   : > { %s3286_s13 = smov 64   ;;  %s3287_s22 = smov 4  }
 0x2cd   : > { %3106 = dma.vmem_to_hbm [thread:$0]  (%p3376_p5), %s3916_s26, 128, %s3914_s17, %s3921_s21, %s3286_s13, %s3286_s13, %s3287_s22  }
 0x2ce PF: > { %p3112_p1 = scmp.ge.s32.totalorder %s3271_s12, 2  ;;  %s2537_s23 = sand.u32 1, %s3259_s30  }
 0x2cf   : > { %s2538_s24 = scalar_lea.sflag [#allocation6], %s2537_s23 }
 0x2d0   : > { %p3109_p2 = pnand %p3112_p1, %p3380_p6 }
 0x2d2   : > { %p3110_p3 = pneg %p3109_p2 }
 0x2d4   : > { %3254 = dma.done.wait (%p3110_p3), %s2538_s24, 128  }
 0x2d5   : > { %3256 = vsyncadd (%p3110_p3), %s2538_s24, 4294967168  ;;  %p19_p4 = scmp.ge.s32.totalorder %s3363_s15, 4   ;;  %s3977_s30 = smov %s3263_s10 }
 0x2d6   : > { %s3978_s10 = smov %s3267_s11  ;;  %s3979_s11 = smov %s3374_s18 }
 0x2d7   : > { %s3980_s12 = smov %s3363_s15  ;;  %21 = sbr.rel (!%p19_p4) target bundleno = 3 (0x3), region = 327 }
 0x2dc   :  { %2543 = vsyncpa [#allocation6], 1 }
 0x2dd   :  { %2545 = vsyncpa [#allocation6 + $0x1], 1 }

</bundles_post_ra>
